<compile_context>
chip_gen: v5e
topology: v5e:2x2
jax: 0.10.0
libtpu: 0.0.40
codegen_flags: <defaults>
</compile_context>

<pallas_src>
import functools

import jax
import jax.numpy as jnp
from jax import lax
from jax.experimental import pallas as pl
from jax.experimental.pallas import tpu as pltpu

NEG_SLOPE = 0.2  # DGL GATConv default negative_slope


def _leaky_relu(x):
    return jnp.where(x >= 0, x, NEG_SLOPE * x)


def _elu(x):
    # clamp before exp: cheap insurance against inf on the unselected branch
    return jnp.where(x > 0, x, jnp.exp(jnp.minimum(x, 0.0)) - 1.0)


def _sigmoid(x):
    # exact division (correctness-reviewed): operates on a (T, 1) column only
    x = jnp.clip(x, -30.0, 30.0)
    return 1.0 / (1.0 + jnp.exp(-x))


def sentgat_kernel(
        # tiled along dst(sent) rows
        sent_t_ref,                                   # (T, sent_dim)
        adjb_w2s_ref, adjb_s2s_ref, adjb_S2s_ref,     # (T, Ns_*) additive softmax bias
        rm_w2s_ref, rm_s2s_ref, rm_S2s_ref,           # (T, 1) zero-in-degree masks
        # full-resident node features (constant index maps)
        word_ref, sent_full_ref, sect_ref,
        # word-to-sent GATConv params
        wsrc_w2s_ref, welT_w2s_ref, wer_w2s_ref, b_w2s_ref,
        # sent-to-sent GATConv params (shared fc)
        wsrc_s2s_ref, welT_s2s_ref, wer_s2s_ref, b_s2s_ref,
        # sect-to-sent GATConv params
        wsrc_S2s_ref, welT_S2s_ref, wer_S2s_ref, b_S2s_ref,
        # fusion1 / fusion2 (Linear(2d,1) split into x/y halves; scalar bias in SMEM)
        wfx1_ref, wfy1_ref, bf1_ref,
        wfx2_ref, wfy2_ref, bf2_ref,
        # FFN
        w1_ref, b1_ref, w2_ref, b2_ref,
        out_ref, *, num_heads, head_dim):
    f32 = jnp.float32
    bf16 = jnp.bfloat16
    H, D = num_heads, head_dim

    sent_t = sent_t_ref[...]                          # (T, sent_dim) f32

    def gat(src, wsrc16_ref, welT_ref, wer_ref, b_ref, adjb, rmask):
        """src: (Ns, in) f32. Returns elu(GATConv output) as (T, H*D) f32."""
        # value projection: bf16 MXU operands, f32 accumulate, stored bf16 for the aggregation
        fs16 = jnp.dot(src.astype(bf16), wsrc16_ref[...],
                       preferred_element_type=f32).astype(bf16)           # (Ns, H*D)
        # attention logits via host-folded weights: two ordinary 2-D matmuls
        #   el_t[h, s] = <feat_src[s, h, :], attn_l[h, :]>  (H, Ns)
        #   er[n, h]   = <feat_dst[n, h, :], attn_r[h, :]>  (T, H)
        el_t = lax.dot_general(welT_ref[...], src, (((1,), (1,)), ((), ())),
                               preferred_element_type=f32)                # (H, Ns)
        er = jnp.dot(sent_t, wer_ref[...], preferred_element_type=f32)    # (T, H)

        cols = []
        for h in range(H):                            # static unroll over heads
            # e_ij = leaky_relu(er_i + el_j) + additive mask (0 / -1e9)
            logits = _leaky_relu(er[:, h:h + 1] + el_t[h:h + 1, :]) + adjb  # (T, Ns) f32
            m = jnp.max(logits, axis=-1, keepdims=True)
            p = jnp.exp(logits - m)                   # off-edge terms underflow to exactly 0
            den = jnp.sum(p, axis=-1, keepdims=True)  # (T, 1)
            # per-head aggregation: only this head's D output columns are computed
            th = jnp.dot(p.astype(bf16), fs16[:, h * D:(h + 1) * D],
                         preferred_element_type=f32)                      # (T, D)
            cols.append(th / den)                     # exact softmax normalization
        agg = jnp.concatenate(cols, axis=-1)          # (T, H*D)
        # zero-in-degree rows: aggregate -> 0, keep bias (DGL allow_zero_in_degree semantics)
        return _elu(agg * rmask + b_ref[...])

    w2s = gat(word_ref[...], wsrc_w2s_ref, welT_w2s_ref, wer_w2s_ref, b_w2s_ref,
              adjb_w2s_ref[...], rm_w2s_ref[...])
    s2s = gat(sent_full_ref[...], wsrc_s2s_ref, welT_s2s_ref, wer_s2s_ref, b_s2s_ref,
              adjb_s2s_ref[...], rm_s2s_ref[...])
    S2s = gat(sect_ref[...], wsrc_S2s_ref, welT_S2s_ref, wer_S2s_ref, b_S2s_ref,
              adjb_S2s_ref[...], rm_S2s_ref[...])

    def fusion(x, y, wfx_ref, wfy_ref, b_scalar):
        # sigmoid(Linear(2d,1)([x,y])) as two VPU row reductions (no concat, no 1-lane matmul)
        z = _sigmoid(jnp.sum(x * wfx_ref[...], axis=-1, keepdims=True)
                     + jnp.sum(y * wfy_ref[...], axis=-1, keepdims=True) + b_scalar)
        return z * x + (1.0 - z) * y

    wS_update = fusion(w2s, S2s, wfx1_ref, wfy1_ref, bf1_ref[0, 0])
    update = fusion(wS_update, s2s, wfx2_ref, wfy2_ref, bf2_ref[0, 0])

    # dropout == identity (eval); FFN(residual + update), bf16 MXU operands, f32 accumulate
    h = sent_t + update
    h1 = jnp.maximum(
        jnp.dot(h.astype(bf16), w1_ref[...], preferred_element_type=f32) + b1_ref[...], 0.0)
    out_ref[...] = (jnp.dot(h1.astype(bf16), w2_ref[...], preferred_element_type=f32)
                    + b2_ref[...])


def sentgat_forward(params, adj_w2s, adj_s2s, adj_S2s, word_repr, sent_repr, sect_repr,
                    num_heads, *, block_sent=128):
    p = params
    f32 = jnp.float32
    n_sent, sent_dim = sent_repr.shape
    n_word = word_repr.shape[0]
    n_sect = sect_repr.shape[0]
    assert sent_dim % num_heads == 0
    head_dim = sent_dim // num_heads

    T = min(block_sent, n_sent)
    assert n_sent % T == 0, "TODO(synk): pad n_sent to a multiple of the dst tile"
    grid = (n_sent // T,)

    # host-side: adjacency -> additive softmax bias + zero-in-degree row masks
    def bias_of(adj):
        return jnp.where(adj > 0.5, 0.0, -1e9).astype(f32)

    def rmask_of(adj):
        return (jnp.sum(adj, axis=-1, keepdims=True) > 0).astype(f32)

    args = (sent_repr,
            bias_of(adj_w2s), bias_of(adj_s2s), bias_of(adj_S2s),
            rmask_of(adj_w2s), rmask_of(adj_s2s), rmask_of(adj_S2s),
            word_repr, sent_repr, sect_repr,
            p["wsrc_w2s"], p["welT_w2s"], p["wer_w2s"], p["b_w2s"],
            p["wsrc_s2s"], p["welT_s2s"], p["wer_s2s"], p["b_s2s"],
            p["wsrc_S2s"], p["welT_S2s"], p["wer_S2s"], p["b_S2s"],
            p["wfx1"], p["wfy1"], p["bf1"],
            p["wfx2"], p["wfy2"], p["bf2"],
            p["w1"], p["b1"], p["w2"], p["b2"])

    def tiled(width):
        return pl.BlockSpec((T, width), lambda i: (i, 0))

    def const(a):
        # full-array block, constant index map -> stays VMEM-resident across grid steps
        return pl.BlockSpec(a.shape, lambda i: (0, 0))

    smem = pl.BlockSpec(memory_space=pltpu.MemorySpace.SMEM)

    in_specs = [
        tiled(sent_dim),
        tiled(n_word), tiled(n_sent), tiled(n_sect),
        tiled(1), tiled(1), tiled(1),
        const(word_repr), const(sent_repr), const(sect_repr),
        const(p["wsrc_w2s"]), const(p["welT_w2s"]), const(p["wer_w2s"]), const(p["b_w2s"]),
        const(p["wsrc_s2s"]), const(p["welT_s2s"]), const(p["wer_s2s"]), const(p["b_s2s"]),
        const(p["wsrc_S2s"]), const(p["welT_S2s"]), const(p["wer_S2s"]), const(p["b_S2s"]),
        const(p["wfx1"]), const(p["wfy1"]), smem,
        const(p["wfx2"]), const(p["wfy2"]), smem,
        const(p["w1"]), const(p["b1"]), const(p["w2"]), const(p["b2"]),
    ]

    kernel = functools.partial(sentgat_kernel, num_heads=num_heads, head_dim=head_dim)
    return pl.pallas_call(
        kernel,
        out_shape=jax.ShapeDtypeStruct((n_sent, sent_dim), f32),
        grid=grid,
        in_specs=in_specs,
        out_specs=pl.BlockSpec((T, sent_dim), lambda i: (i, 0)),
        compiler_params=pltpu.CompilerParams(
            dimension_semantics=("parallel",),       # megacore split on v7x; no-op on v5e/v6e
            vmem_limit_bytes=32 * 1024 * 1024),
    )(*args)


# ---------- host-side parameter preprocessing ----------

def prepare_params(raw, num_heads, head_dim):
    """Fold attn_l / attn_r into the fc weights and cast value-path weights to bf16."""
    bf16 = jnp.bfloat16

    def fold(w, a, dst):
        in_dim = w.shape[0]
        w3 = w.reshape(in_dim, num_heads, head_dim)
        if dst:   # er = x_dst @ w_er           -> (in, H)
            return jnp.einsum("ihd,hd->ih", w3, a)
        # el_t = dot_general(w_elT, x_src)      -> (H, in)
        return jnp.einsum("ihd,hd->hi", w3, a)

    return dict(
        wsrc_w2s=raw["w_src_w2s"].astype(bf16),
        welT_w2s=fold(raw["w_src_w2s"], raw["attn_l_w2s"], dst=False),
        wer_w2s=fold(raw["w_dst_w2s"], raw["attn_r_w2s"], dst=True),
        b_w2s=raw["b_w2s"],
        wsrc_s2s=raw["w_s2s"].astype(bf16),
        welT_s2s=fold(raw["w_s2s"], raw["attn_l_s2s"], dst=False),
        wer_s2s=fold(raw["w_s2s"], raw["attn_r_s2s"], dst=True),
        b_s2s=raw["b_s2s"],
        wsrc_S2s=raw["w_src_S2s"].astype(bf16),
        welT_S2s=fold(raw["w_src_S2s"], raw["attn_l_S2s"], dst=False),
        wer_S2s=fold(raw["w_dst_S2s"], raw["attn_r_S2s"], dst=True),
        b_S2s=raw["b_S2s"],
        wfx1=raw["wfx1"], wfy1=raw["wfy1"], bf1=raw["bf1"],
        wfx2=raw["wfx2"], wfy2=raw["wfy2"], bf2=raw["bf2"],
        w1=raw["w1"].astype(bf16), b1=raw["b1"],
        w2=raw["w2"].astype(bf16), b2=raw["b2"],
    )


if __name__ == "__main__":
    word_dim, sent_dim, sect_dim = 48, 32, 24
    num_heads, ffn_inner = 4, 64
    head_dim = sent_dim // num_heads
    n_word, n_sent, n_sect = 32, 16, 4

    key = jax.random.PRNGKey(0)
    ks = jax.random.split(key, 32)

    def init(k, shape, scale=0.1):
        return (scale * jax.random.normal(k, shape)).astype(jnp.float32)

    hd = num_heads * head_dim   # == sent_dim
    raw = dict(
        # word-to-sent GATConv: fc_src(word->H*D), fc_dst(sent->H*D), attn_l/r, bias
        w_src_w2s=init(ks[0], (word_dim, hd)),
        w_dst_w2s=init(ks[1], (sent_dim, hd)),
        attn_l_w2s=init(ks[2], (num_heads, head_dim)),
        attn_r_w2s=init(ks[3], (num_heads, head_dim)),
        b_w2s=init(ks[4], (1, hd), scale=0.02),
        # sent-to-sent GATConv (shared fc)
        w_s2s=init(ks[5], (sent_dim, hd)),
        attn_l_s2s=init(ks[6], (num_heads, head_dim)),
        attn_r_s2s=init(ks[7], (num_heads, head_dim)),
        b_s2s=init(ks[8], (1, hd), scale=0.02),
        # sect-to-sent GATConv
        w_src_S2s=init(ks[9], (sect_dim, hd)),
        w_dst_S2s=init(ks[10], (sent_dim, hd)),
        attn_l_S2s=init(ks[11], (num_heads, head_dim)),
        attn_r_S2s=init(ks[12], (num_heads, head_dim)),
        b_S2s=init(ks[13], (1, hd), scale=0.02),
        # Fusion1 / Fusion2: Linear(2*sent_dim -> 1) split into x/y halves
        wfx1=init(ks[14], (1, sent_dim)), wfy1=init(ks[15], (1, sent_dim)),
        bf1=init(ks[16], (1, 1), scale=0.02),
        wfx2=init(ks[17], (1, sent_dim)), wfy2=init(ks[18], (1, sent_dim)),
        bf2=init(ks[19], (1, 1), scale=0.02),
        # FFN: Linear(sent_dim -> ffn_inner) -> ReLU -> Linear(ffn_inner -> sent_dim)
        w1=init(ks[20], (sent_dim, ffn_inner)),
        b1=init(ks[21], (1, ffn_inner), scale=0.02),
        w2=init(ks[22], (ffn_inner, sent_dim)),
        b2=init(ks[23], (1, sent_dim), scale=0.02),
    )
    params = prepare_params(raw, num_heads, head_dim)

    word_repr = init(ks[24], (n_word, word_dim), scale=1.0)
    sent_repr = init(ks[25], (n_sent, sent_dim), scale=1.0)
    sect_repr = init(ks[26], (n_sect, sect_dim), scale=1.0)

    # Deterministic heterograph as dense adjacency masks (rows = dst sentence nodes):
    #   word w belongs to sentence w // (n_word // n_sent)    -> word-to-sent edges
    #   sentences connect to neighbours |i-j| <= 1 (incl self) -> sent-to-sent edges
    #   sentence s belongs to section s // (n_sent // n_sect)  -> sect-to-sent edges
    sent_of_word = jnp.arange(n_word) // (n_word // n_sent)
    adj_w2s = (sent_of_word[None, :] == jnp.arange(n_sent)[:, None]).astype(jnp.float32)
    ii = jnp.arange(n_sent)
    adj_s2s = (jnp.abs(ii[:, None] - ii[None, :]) <= 1).astype(jnp.float32)
    sect_of_sent = jnp.arange(n_sent) // (n_sent // n_sect)
    adj_S2s = (sect_of_sent[:, None] == jnp.arange(n_sect)[None, :]).astype(jnp.float32)

    out = sentgat_forward(params, adj_w2s, adj_s2s, adj_S2s,
                          word_repr, sent_repr, sect_repr, num_heads,
                          block_sent=8)   # grid=(2,): exercises the parallel dst-row tiling
    out = jax.block_until_ready(out)
    assert out.shape == (n_sent, sent_dim) and out.dtype == jnp.float32
    assert bool(jnp.all(jnp.isfinite(out)))
    print("KERNEL_OK")
</pallas_src>

<mosaic_0001>
module attributes {stable_mosaic.version = 11 : i64} {
  func.func @sentgat_kernel(%arg0: i32, %arg1: memref<8x32xf32, #tpu.memory_space<vmem>>, %arg2: memref<8x32xf32, #tpu.memory_space<vmem>>, %arg3: memref<8x16xf32, #tpu.memory_space<vmem>>, %arg4: memref<8x4xf32, #tpu.memory_space<vmem>>, %arg5: memref<8x1xf32, #tpu.memory_space<vmem>>, %arg6: memref<8x1xf32, #tpu.memory_space<vmem>>, %arg7: memref<8x1xf32, #tpu.memory_space<vmem>>, %arg8: memref<32x48xf32, #tpu.memory_space<vmem>>, %arg9: memref<16x32xf32, #tpu.memory_space<vmem>>, %arg10: memref<4x24xf32, #tpu.memory_space<vmem>>, %arg11: memref<48x32xbf16, #tpu.memory_space<vmem>>, %arg12: memref<4x48xf32, #tpu.memory_space<vmem>>, %arg13: memref<32x4xf32, #tpu.memory_space<vmem>>, %arg14: memref<1x32xf32, #tpu.memory_space<vmem>>, %arg15: memref<32x32xbf16, #tpu.memory_space<vmem>>, %arg16: memref<4x32xf32, #tpu.memory_space<vmem>>, %arg17: memref<32x4xf32, #tpu.memory_space<vmem>>, %arg18: memref<1x32xf32, #tpu.memory_space<vmem>>, %arg19: memref<24x32xbf16, #tpu.memory_space<vmem>>, %arg20: memref<4x24xf32, #tpu.memory_space<vmem>>, %arg21: memref<32x4xf32, #tpu.memory_space<vmem>>, %arg22: memref<1x32xf32, #tpu.memory_space<vmem>>, %arg23: memref<1x32xf32, #tpu.memory_space<vmem>>, %arg24: memref<1x32xf32, #tpu.memory_space<vmem>>, %arg25: memref<1x1xf32, #tpu.memory_space<smem>>, %arg26: memref<1x32xf32, #tpu.memory_space<vmem>>, %arg27: memref<1x32xf32, #tpu.memory_space<vmem>>, %arg28: memref<1x1xf32, #tpu.memory_space<smem>>, %arg29: memref<32x64xbf16, #tpu.memory_space<vmem>>, %arg30: memref<1x64xf32, #tpu.memory_space<vmem>>, %arg31: memref<64x32xbf16, #tpu.memory_space<vmem>>, %arg32: memref<1x32xf32, #tpu.memory_space<vmem>>, %arg33: memref<8x32xf32, #tpu.memory_space<vmem>>) attributes {dimension_semantics = [#tpu.dimension_semantics<parallel>], iteration_bounds = array<i64: 2>, scalar_prefetch = 0 : i64, scratch_operands = 0 : i64, tpu.core_type = #tpu.core_type<tc>, window_params = [{transform_indices = @transform_0, window_bounds = array<i64: 8, 32>}, {transform_indices = @transform_1, window_bounds = array<i64: 8, 32>}, {transform_indices = @transform_2, window_bounds = array<i64: 8, 16>}, {transform_indices = @transform_3, window_bounds = array<i64: 8, 4>}, {transform_indices = @transform_4, window_bounds = array<i64: 8, 1>}, {transform_indices = @transform_5, window_bounds = array<i64: 8, 1>}, {transform_indices = @transform_6, window_bounds = array<i64: 8, 1>}, {pipeline_mode = #tpu.pipeline_mode<synchronous>, transform_indices = @transform_7, window_bounds = array<i64: 32, 48>}, {pipeline_mode = #tpu.pipeline_mode<synchronous>, transform_indices = @transform_8, window_bounds = array<i64: 16, 32>}, {pipeline_mode = #tpu.pipeline_mode<synchronous>, transform_indices = @transform_9, window_bounds = array<i64: 4, 24>}, {pipeline_mode = #tpu.pipeline_mode<synchronous>, transform_indices = @transform_10, window_bounds = array<i64: 48, 32>}, {pipeline_mode = #tpu.pipeline_mode<synchronous>, transform_indices = @transform_11, window_bounds = array<i64: 4, 48>}, {pipeline_mode = #tpu.pipeline_mode<synchronous>, transform_indices = @transform_12, window_bounds = array<i64: 32, 4>}, {pipeline_mode = #tpu.pipeline_mode<synchronous>, transform_indices = @transform_13, window_bounds = array<i64: 1, 32>}, {pipeline_mode = #tpu.pipeline_mode<synchronous>, transform_indices = @transform_14, window_bounds = array<i64: 32, 32>}, {pipeline_mode = #tpu.pipeline_mode<synchronous>, transform_indices = @transform_15, window_bounds = array<i64: 4, 32>}, {pipeline_mode = #tpu.pipeline_mode<synchronous>, transform_indices = @transform_16, window_bounds = array<i64: 32, 4>}, {pipeline_mode = #tpu.pipeline_mode<synchronous>, transform_indices = @transform_17, window_bounds = array<i64: 1, 32>}, {pipeline_mode = #tpu.pipeline_mode<synchronous>, transform_indices = @transform_18, window_bounds = array<i64: 24, 32>}, {pipeline_mode = #tpu.pipeline_mode<synchronous>, transform_indices = @transform_19, window_bounds = array<i64: 4, 24>}, {pipeline_mode = #tpu.pipeline_mode<synchronous>, transform_indices = @transform_20, window_bounds = array<i64: 32, 4>}, {pipeline_mode = #tpu.pipeline_mode<synchronous>, transform_indices = @transform_21, window_bounds = array<i64: 1, 32>}, {pipeline_mode = #tpu.pipeline_mode<synchronous>, transform_indices = @transform_22, window_bounds = array<i64: 1, 32>}, {pipeline_mode = #tpu.pipeline_mode<synchronous>, transform_indices = @transform_23, window_bounds = array<i64: 1, 32>}, {transform_indices = @transform_24, window_bounds = array<i64: 1, 1>}, {pipeline_mode = #tpu.pipeline_mode<synchronous>, transform_indices = @transform_25, window_bounds = array<i64: 1, 32>}, {pipeline_mode = #tpu.pipeline_mode<synchronous>, transform_indices = @transform_26, window_bounds = array<i64: 1, 32>}, {transform_indices = @transform_27, window_bounds = array<i64: 1, 1>}, {pipeline_mode = #tpu.pipeline_mode<synchronous>, transform_indices = @transform_28, window_bounds = array<i64: 32, 64>}, {pipeline_mode = #tpu.pipeline_mode<synchronous>, transform_indices = @transform_29, window_bounds = array<i64: 1, 64>}, {pipeline_mode = #tpu.pipeline_mode<synchronous>, transform_indices = @transform_30, window_bounds = array<i64: 64, 32>}, {pipeline_mode = #tpu.pipeline_mode<synchronous>, transform_indices = @transform_31, window_bounds = array<i64: 1, 32>}, {transform_indices = @transform_32, window_bounds = array<i64: 8, 32>}]} {
    %c0 = arith.constant 0 : index
    %c0_0 = arith.constant 0 : index
    %0 = vector.load %arg1[%c0, %c0_0] : memref<8x32xf32, #tpu.memory_space<vmem>>, vector<8x32xf32>
    %c0_1 = arith.constant 0 : index
    %c0_2 = arith.constant 0 : index
    %1 = vector.load %arg8[%c0_1, %c0_2] : memref<32x48xf32, #tpu.memory_space<vmem>>, vector<32x48xf32>
    %c0_3 = arith.constant 0 : index
    %c0_4 = arith.constant 0 : index
    %2 = vector.load %arg2[%c0_3, %c0_4] : memref<8x32xf32, #tpu.memory_space<vmem>>, vector<8x32xf32>
    %c0_5 = arith.constant 0 : index
    %c0_6 = arith.constant 0 : index
    %3 = vector.load %arg5[%c0_5, %c0_6] : memref<8x1xf32, #tpu.memory_space<vmem>>, vector<8x1xf32>
    %4 = arith.truncf %1 : vector<32x48xf32> to vector<32x48xbf16>
    %c0_7 = arith.constant 0 : index
    %c0_8 = arith.constant 0 : index
    %5 = vector.load %arg11[%c0_7, %c0_8] : memref<48x32xbf16, #tpu.memory_space<vmem>>, vector<48x32xbf16>
    %cst = arith.constant dense<0.000000e+00> : vector<32x32xf32>
    %6 = tpu.matmul %4, %5, %cst {dimension_numbers = #tpu.dot_dimension_numbers<[1], [0], [0], [1], [0, 0, 1, 1], [], []>} : vector<32x48xbf16>, vector<48x32xbf16>, vector<32x32xf32> -> vector<32x32xf32>
    %7 = arith.truncf %6 : vector<32x32xf32> to vector<32x32xbf16>
    %c0_9 = arith.constant 0 : index
    %c0_10 = arith.constant 0 : index
    %8 = vector.load %arg12[%c0_9, %c0_10] : memref<4x48xf32, #tpu.memory_space<vmem>>, vector<4x48xf32>
    %cst_11 = arith.constant dense<0.000000e+00> : vector<4x32xf32>
    %9 = tpu.matmul %8, %1, %cst_11 {dimension_numbers = #tpu.dot_dimension_numbers<[1], [1], [0], [0], [0, 0, 1, 0], [], []>} : vector<4x48xf32>, vector<32x48xf32>, vector<4x32xf32> -> vector<4x32xf32>
    %c0_12 = arith.constant 0 : index
    %c0_13 = arith.constant 0 : index
    %10 = vector.load %arg13[%c0_12, %c0_13] : memref<32x4xf32, #tpu.memory_space<vmem>>, vector<32x4xf32>
    %cst_14 = arith.constant dense<0.000000e+00> : vector<8x4xf32>
    %11 = tpu.matmul %0, %10, %cst_14 {dimension_numbers = #tpu.dot_dimension_numbers<[1], [0], [0], [1], [0, 0, 1, 1], [], []>} : vector<8x32xf32>, vector<32x4xf32>, vector<8x4xf32> -> vector<8x4xf32>
    %12 = vector.extract_strided_slice %11 {offsets = [0, 0], sizes = [8, 1], strides = [1, 1]} : vector<8x4xf32> to vector<8x1xf32>
    %13 = vector.extract_strided_slice %9 {offsets = [0, 0], sizes = [1, 32], strides = [1, 1]} : vector<4x32xf32> to vector<1x32xf32>
    %14 = vector.broadcast %12 : vector<8x1xf32> to vector<8x32xf32>
    %15 = vector.broadcast %13 : vector<1x32xf32> to vector<8x32xf32>
    %16 = arith.addf %14, %15 : vector<8x32xf32>
    %cst_15 = arith.constant 0.000000e+00 : f32
    %17 = vector.broadcast %cst_15 : f32 to vector<8x32xf32>
    %18 = arith.cmpf oge, %16, %17 : vector<8x32xf32>
    %cst_16 = arith.constant 2.000000e-01 : f32
    %19 = vector.broadcast %cst_16 : f32 to vector<8x32xf32>
    %20 = arith.mulf %19, %16 : vector<8x32xf32>
    %21 = arith.select %18, %16, %20 : vector<8x32xi1>, vector<8x32xf32>
    %22 = arith.addf %21, %2 : vector<8x32xf32>
    %cst_17 = arith.constant dense<0xFF800000> : vector<8xf32>
    %23 = vector.multi_reduction <maximumf>, %22, %cst_17 [1] : vector<8x32xf32> to vector<8xf32>
    %24 = vector.shape_cast %23 : vector<8xf32> to vector<8x1xf32>
    %25 = vector.broadcast %24 : vector<8x1xf32> to vector<8x32xf32>
    %26 = arith.subf %22, %25 : vector<8x32xf32>
    %27 = math.exp %26 : vector<8x32xf32>
    %cst_18 = arith.constant dense<0.000000e+00> : vector<8xf32>
    %28 = vector.multi_reduction <add>, %27, %cst_18 [1] : vector<8x32xf32> to vector<8xf32>
    %29 = vector.shape_cast %28 : vector<8xf32> to vector<8x1xf32>
    %30 = arith.truncf %27 : vector<8x32xf32> to vector<8x32xbf16>
    %31 = vector.extract_strided_slice %7 {offsets = [0, 0], sizes = [32, 8], strides = [1, 1]} : vector<32x32xbf16> to vector<32x8xbf16>
    %cst_19 = arith.constant dense<0.000000e+00> : vector<8x8xf32>
    %32 = tpu.matmul %30, %31, %cst_19 {dimension_numbers = #tpu.dot_dimension_numbers<[1], [0], [0], [1], [0, 0, 1, 1], [], []>} : vector<8x32xbf16>, vector<32x8xbf16>, vector<8x8xf32> -> vector<8x8xf32>
    %33 = vector.broadcast %29 : vector<8x1xf32> to vector<8x8xf32>
    %34 = arith.divf %32, %33 : vector<8x8xf32>
    %35 = vector.extract_strided_slice %11 {offsets = [0, 1], sizes = [8, 1], strides = [1, 1]} : vector<8x4xf32> to vector<8x1xf32>
    %36 = vector.extract_strided_slice %9 {offsets = [1, 0], sizes = [1, 32], strides = [1, 1]} : vector<4x32xf32> to vector<1x32xf32>
    %37 = vector.broadcast %35 : vector<8x1xf32> to vector<8x32xf32>
    %38 = vector.broadcast %36 : vector<1x32xf32> to vector<8x32xf32>
    %39 = arith.addf %37, %38 : vector<8x32xf32>
    %cst_20 = arith.constant 0.000000e+00 : f32
    %40 = vector.broadcast %cst_20 : f32 to vector<8x32xf32>
    %41 = arith.cmpf oge, %39, %40 : vector<8x32xf32>
    %cst_21 = arith.constant 2.000000e-01 : f32
    %42 = vector.broadcast %cst_21 : f32 to vector<8x32xf32>
    %43 = arith.mulf %42, %39 : vector<8x32xf32>
    %44 = arith.select %41, %39, %43 : vector<8x32xi1>, vector<8x32xf32>
    %45 = arith.addf %44, %2 : vector<8x32xf32>
    %cst_22 = arith.constant dense<0xFF800000> : vector<8xf32>
    %46 = vector.multi_reduction <maximumf>, %45, %cst_22 [1] : vector<8x32xf32> to vector<8xf32>
    %47 = vector.shape_cast %46 : vector<8xf32> to vector<8x1xf32>
    %48 = vector.broadcast %47 : vector<8x1xf32> to vector<8x32xf32>
    %49 = arith.subf %45, %48 : vector<8x32xf32>
    %50 = math.exp %49 : vector<8x32xf32>
    %cst_23 = arith.constant dense<0.000000e+00> : vector<8xf32>
    %51 = vector.multi_reduction <add>, %50, %cst_23 [1] : vector<8x32xf32> to vector<8xf32>
    %52 = vector.shape_cast %51 : vector<8xf32> to vector<8x1xf32>
    %53 = arith.truncf %50 : vector<8x32xf32> to vector<8x32xbf16>
    %54 = vector.extract_strided_slice %7 {offsets = [0, 8], sizes = [32, 8], strides = [1, 1]} : vector<32x32xbf16> to vector<32x8xbf16>
    %cst_24 = arith.constant dense<0.000000e+00> : vector<8x8xf32>
    %55 = tpu.matmul %53, %54, %cst_24 {dimension_numbers = #tpu.dot_dimension_numbers<[1], [0], [0], [1], [0, 0, 1, 1], [], []>} : vector<8x32xbf16>, vector<32x8xbf16>, vector<8x8xf32> -> vector<8x8xf32>
    %56 = vector.broadcast %52 : vector<8x1xf32> to vector<8x8xf32>
    %57 = arith.divf %55, %56 : vector<8x8xf32>
    %58 = vector.extract_strided_slice %11 {offsets = [0, 2], sizes = [8, 1], strides = [1, 1]} : vector<8x4xf32> to vector<8x1xf32>
    %59 = vector.extract_strided_slice %9 {offsets = [2, 0], sizes = [1, 32], strides = [1, 1]} : vector<4x32xf32> to vector<1x32xf32>
    %60 = vector.broadcast %58 : vector<8x1xf32> to vector<8x32xf32>
    %61 = vector.broadcast %59 : vector<1x32xf32> to vector<8x32xf32>
    %62 = arith.addf %60, %61 : vector<8x32xf32>
    %cst_25 = arith.constant 0.000000e+00 : f32
    %63 = vector.broadcast %cst_25 : f32 to vector<8x32xf32>
    %64 = arith.cmpf oge, %62, %63 : vector<8x32xf32>
    %cst_26 = arith.constant 2.000000e-01 : f32
    %65 = vector.broadcast %cst_26 : f32 to vector<8x32xf32>
    %66 = arith.mulf %65, %62 : vector<8x32xf32>
    %67 = arith.select %64, %62, %66 : vector<8x32xi1>, vector<8x32xf32>
    %68 = arith.addf %67, %2 : vector<8x32xf32>
    %cst_27 = arith.constant dense<0xFF800000> : vector<8xf32>
    %69 = vector.multi_reduction <maximumf>, %68, %cst_27 [1] : vector<8x32xf32> to vector<8xf32>
    %70 = vector.shape_cast %69 : vector<8xf32> to vector<8x1xf32>
    %71 = vector.broadcast %70 : vector<8x1xf32> to vector<8x32xf32>
    %72 = arith.subf %68, %71 : vector<8x32xf32>
    %73 = math.exp %72 : vector<8x32xf32>
    %cst_28 = arith.constant dense<0.000000e+00> : vector<8xf32>
    %74 = vector.multi_reduction <add>, %73, %cst_28 [1] : vector<8x32xf32> to vector<8xf32>
    %75 = vector.shape_cast %74 : vector<8xf32> to vector<8x1xf32>
    %76 = arith.truncf %73 : vector<8x32xf32> to vector<8x32xbf16>
    %77 = vector.extract_strided_slice %7 {offsets = [0, 16], sizes = [32, 8], strides = [1, 1]} : vector<32x32xbf16> to vector<32x8xbf16>
    %cst_29 = arith.constant dense<0.000000e+00> : vector<8x8xf32>
    %78 = tpu.matmul %76, %77, %cst_29 {dimension_numbers = #tpu.dot_dimension_numbers<[1], [0], [0], [1], [0, 0, 1, 1], [], []>} : vector<8x32xbf16>, vector<32x8xbf16>, vector<8x8xf32> -> vector<8x8xf32>
    %79 = vector.broadcast %75 : vector<8x1xf32> to vector<8x8xf32>
    %80 = arith.divf %78, %79 : vector<8x8xf32>
    %81 = vector.extract_strided_slice %11 {offsets = [0, 3], sizes = [8, 1], strides = [1, 1]} : vector<8x4xf32> to vector<8x1xf32>
    %82 = vector.extract_strided_slice %9 {offsets = [3, 0], sizes = [1, 32], strides = [1, 1]} : vector<4x32xf32> to vector<1x32xf32>
    %83 = vector.broadcast %81 : vector<8x1xf32> to vector<8x32xf32>
    %84 = vector.broadcast %82 : vector<1x32xf32> to vector<8x32xf32>
    %85 = arith.addf %83, %84 : vector<8x32xf32>
    %cst_30 = arith.constant 0.000000e+00 : f32
    %86 = vector.broadcast %cst_30 : f32 to vector<8x32xf32>
    %87 = arith.cmpf oge, %85, %86 : vector<8x32xf32>
    %cst_31 = arith.constant 2.000000e-01 : f32
    %88 = vector.broadcast %cst_31 : f32 to vector<8x32xf32>
    %89 = arith.mulf %88, %85 : vector<8x32xf32>
    %90 = arith.select %87, %85, %89 : vector<8x32xi1>, vector<8x32xf32>
    %91 = arith.addf %90, %2 : vector<8x32xf32>
    %cst_32 = arith.constant dense<0xFF800000> : vector<8xf32>
    %92 = vector.multi_reduction <maximumf>, %91, %cst_32 [1] : vector<8x32xf32> to vector<8xf32>
    %93 = vector.shape_cast %92 : vector<8xf32> to vector<8x1xf32>
    %94 = vector.broadcast %93 : vector<8x1xf32> to vector<8x32xf32>
    %95 = arith.subf %91, %94 : vector<8x32xf32>
    %96 = math.exp %95 : vector<8x32xf32>
    %cst_33 = arith.constant dense<0.000000e+00> : vector<8xf32>
    %97 = vector.multi_reduction <add>, %96, %cst_33 [1] : vector<8x32xf32> to vector<8xf32>
    %98 = vector.shape_cast %97 : vector<8xf32> to vector<8x1xf32>
    %99 = arith.truncf %96 : vector<8x32xf32> to vector<8x32xbf16>
    %100 = vector.extract_strided_slice %7 {offsets = [0, 24], sizes = [32, 8], strides = [1, 1]} : vector<32x32xbf16> to vector<32x8xbf16>
    %cst_34 = arith.constant dense<0.000000e+00> : vector<8x8xf32>
    %101 = tpu.matmul %99, %100, %cst_34 {dimension_numbers = #tpu.dot_dimension_numbers<[1], [0], [0], [1], [0, 0, 1, 1], [], []>} : vector<8x32xbf16>, vector<32x8xbf16>, vector<8x8xf32> -> vector<8x8xf32>
    %102 = vector.broadcast %98 : vector<8x1xf32> to vector<8x8xf32>
    %103 = arith.divf %101, %102 : vector<8x8xf32>
    %104 = tpu.concatenate %34, %57, %80, %103 in 1 : vector<8x8xf32>, vector<8x8xf32>, vector<8x8xf32>, vector<8x8xf32> -> vector<8x32xf32>
    %105 = vector.broadcast %3 : vector<8x1xf32> to vector<8x32xf32>
    %106 = arith.mulf %104, %105 : vector<8x32xf32>
    %c0_35 = arith.constant 0 : index
    %c0_36 = arith.constant 0 : index
    %107 = vector.load %arg14[%c0_35, %c0_36] : memref<1x32xf32, #tpu.memory_space<vmem>>, vector<1x32xf32>
    %108 = vector.broadcast %107 : vector<1x32xf32> to vector<8x32xf32>
    %109 = arith.addf %106, %108 : vector<8x32xf32>
    %cst_37 = arith.constant 0.000000e+00 : f32
    %110 = vector.broadcast %cst_37 : f32 to vector<8x32xf32>
    %111 = arith.cmpf ogt, %109, %110 : vector<8x32xf32>
    %cst_38 = arith.constant 0.000000e+00 : f32
    %112 = vector.broadcast %cst_38 : f32 to vector<8x32xf32>
    %113 = arith.minimumf %109, %112 : vector<8x32xf32>
    %114 = math.exp %113 : vector<8x32xf32>
    %cst_39 = arith.constant 1.000000e+00 : f32
    %115 = vector.broadcast %cst_39 : f32 to vector<8x32xf32>
    %116 = arith.subf %114, %115 : vector<8x32xf32>
    %117 = arith.select %111, %109, %116 : vector<8x32xi1>, vector<8x32xf32>
    %c0_40 = arith.constant 0 : index
    %c0_41 = arith.constant 0 : index
    %118 = vector.load %arg9[%c0_40, %c0_41] : memref<16x32xf32, #tpu.memory_space<vmem>>, vector<16x32xf32>
    %c0_42 = arith.constant 0 : index
    %c0_43 = arith.constant 0 : index
    %119 = vector.load %arg3[%c0_42, %c0_43] : memref<8x16xf32, #tpu.memory_space<vmem>>, vector<8x16xf32>
    %c0_44 = arith.constant 0 : index
    %c0_45 = arith.constant 0 : index
    %120 = vector.load %arg6[%c0_44, %c0_45] : memref<8x1xf32, #tpu.memory_space<vmem>>, vector<8x1xf32>
    %121 = arith.truncf %118 : vector<16x32xf32> to vector<16x32xbf16>
    %c0_46 = arith.constant 0 : index
    %c0_47 = arith.constant 0 : index
    %122 = vector.load %arg15[%c0_46, %c0_47] : memref<32x32xbf16, #tpu.memory_space<vmem>>, vector<32x32xbf16>
    %cst_48 = arith.constant dense<0.000000e+00> : vector<16x32xf32>
    %123 = tpu.matmul %121, %122, %cst_48 {dimension_numbers = #tpu.dot_dimension_numbers<[1], [0], [0], [1], [0, 0, 1, 1], [], []>} : vector<16x32xbf16>, vector<32x32xbf16>, vector<16x32xf32> -> vector<16x32xf32>
    %124 = arith.truncf %123 : vector<16x32xf32> to vector<16x32xbf16>
    %c0_49 = arith.constant 0 : index
    %c0_50 = arith.constant 0 : index
    %125 = vector.load %arg16[%c0_49, %c0_50] : memref<4x32xf32, #tpu.memory_space<vmem>>, vector<4x32xf32>
    %cst_51 = arith.constant dense<0.000000e+00> : vector<4x16xf32>
    %126 = tpu.matmul %125, %118, %cst_51 {dimension_numbers = #tpu.dot_dimension_numbers<[1], [1], [0], [0], [0, 0, 1, 0], [], []>} : vector<4x32xf32>, vector<16x32xf32>, vector<4x16xf32> -> vector<4x16xf32>
    %c0_52 = arith.constant 0 : index
    %c0_53 = arith.constant 0 : index
    %127 = vector.load %arg17[%c0_52, %c0_53] : memref<32x4xf32, #tpu.memory_space<vmem>>, vector<32x4xf32>
    %cst_54 = arith.constant dense<0.000000e+00> : vector<8x4xf32>
    %128 = tpu.matmul %0, %127, %cst_54 {dimension_numbers = #tpu.dot_dimension_numbers<[1], [0], [0], [1], [0, 0, 1, 1], [], []>} : vector<8x32xf32>, vector<32x4xf32>, vector<8x4xf32> -> vector<8x4xf32>
    %129 = vector.extract_strided_slice %128 {offsets = [0, 0], sizes = [8, 1], strides = [1, 1]} : vector<8x4xf32> to vector<8x1xf32>
    %130 = vector.extract_strided_slice %126 {offsets = [0, 0], sizes = [1, 16], strides = [1, 1]} : vector<4x16xf32> to vector<1x16xf32>
    %131 = vector.broadcast %129 : vector<8x1xf32> to vector<8x16xf32>
    %132 = vector.broadcast %130 : vector<1x16xf32> to vector<8x16xf32>
    %133 = arith.addf %131, %132 : vector<8x16xf32>
    %cst_55 = arith.constant 0.000000e+00 : f32
    %134 = vector.broadcast %cst_55 : f32 to vector<8x16xf32>
    %135 = arith.cmpf oge, %133, %134 : vector<8x16xf32>
    %cst_56 = arith.constant 2.000000e-01 : f32
    %136 = vector.broadcast %cst_56 : f32 to vector<8x16xf32>
    %137 = arith.mulf %136, %133 : vector<8x16xf32>
    %138 = arith.select %135, %133, %137 : vector<8x16xi1>, vector<8x16xf32>
    %139 = arith.addf %138, %119 : vector<8x16xf32>
    %cst_57 = arith.constant dense<0xFF800000> : vector<8xf32>
    %140 = vector.multi_reduction <maximumf>, %139, %cst_57 [1] : vector<8x16xf32> to vector<8xf32>
    %141 = vector.shape_cast %140 : vector<8xf32> to vector<8x1xf32>
    %142 = vector.broadcast %141 : vector<8x1xf32> to vector<8x16xf32>
    %143 = arith.subf %139, %142 : vector<8x16xf32>
    %144 = math.exp %143 : vector<8x16xf32>
    %cst_58 = arith.constant dense<0.000000e+00> : vector<8xf32>
    %145 = vector.multi_reduction <add>, %144, %cst_58 [1] : vector<8x16xf32> to vector<8xf32>
    %146 = vector.shape_cast %145 : vector<8xf32> to vector<8x1xf32>
    %147 = arith.truncf %144 : vector<8x16xf32> to vector<8x16xbf16>
    %148 = vector.extract_strided_slice %124 {offsets = [0, 0], sizes = [16, 8], strides = [1, 1]} : vector<16x32xbf16> to vector<16x8xbf16>
    %cst_59 = arith.constant dense<0.000000e+00> : vector<8x8xf32>
    %149 = tpu.matmul %147, %148, %cst_59 {dimension_numbers = #tpu.dot_dimension_numbers<[1], [0], [0], [1], [0, 0, 1, 1], [], []>} : vector<8x16xbf16>, vector<16x8xbf16>, vector<8x8xf32> -> vector<8x8xf32>
    %150 = vector.broadcast %146 : vector<8x1xf32> to vector<8x8xf32>
    %151 = arith.divf %149, %150 : vector<8x8xf32>
    %152 = vector.extract_strided_slice %128 {offsets = [0, 1], sizes = [8, 1], strides = [1, 1]} : vector<8x4xf32> to vector<8x1xf32>
    %153 = vector.extract_strided_slice %126 {offsets = [1, 0], sizes = [1, 16], strides = [1, 1]} : vector<4x16xf32> to vector<1x16xf32>
    %154 = vector.broadcast %152 : vector<8x1xf32> to vector<8x16xf32>
    %155 = vector.broadcast %153 : vector<1x16xf32> to vector<8x16xf32>
    %156 = arith.addf %154, %155 : vector<8x16xf32>
    %cst_60 = arith.constant 0.000000e+00 : f32
    %157 = vector.broadcast %cst_60 : f32 to vector<8x16xf32>
    %158 = arith.cmpf oge, %156, %157 : vector<8x16xf32>
    %cst_61 = arith.constant 2.000000e-01 : f32
    %159 = vector.broadcast %cst_61 : f32 to vector<8x16xf32>
    %160 = arith.mulf %159, %156 : vector<8x16xf32>
    %161 = arith.select %158, %156, %160 : vector<8x16xi1>, vector<8x16xf32>
    %162 = arith.addf %161, %119 : vector<8x16xf32>
    %cst_62 = arith.constant dense<0xFF800000> : vector<8xf32>
    %163 = vector.multi_reduction <maximumf>, %162, %cst_62 [1] : vector<8x16xf32> to vector<8xf32>
    %164 = vector.shape_cast %163 : vector<8xf32> to vector<8x1xf32>
    %165 = vector.broadcast %164 : vector<8x1xf32> to vector<8x16xf32>
    %166 = arith.subf %162, %165 : vector<8x16xf32>
    %167 = math.exp %166 : vector<8x16xf32>
    %cst_63 = arith.constant dense<0.000000e+00> : vector<8xf32>
    %168 = vector.multi_reduction <add>, %167, %cst_63 [1] : vector<8x16xf32> to vector<8xf32>
    %169 = vector.shape_cast %168 : vector<8xf32> to vector<8x1xf32>
    %170 = arith.truncf %167 : vector<8x16xf32> to vector<8x16xbf16>
    %171 = vector.extract_strided_slice %124 {offsets = [0, 8], sizes = [16, 8], strides = [1, 1]} : vector<16x32xbf16> to vector<16x8xbf16>
    %cst_64 = arith.constant dense<0.000000e+00> : vector<8x8xf32>
    %172 = tpu.matmul %170, %171, %cst_64 {dimension_numbers = #tpu.dot_dimension_numbers<[1], [0], [0], [1], [0, 0, 1, 1], [], []>} : vector<8x16xbf16>, vector<16x8xbf16>, vector<8x8xf32> -> vector<8x8xf32>
    %173 = vector.broadcast %169 : vector<8x1xf32> to vector<8x8xf32>
    %174 = arith.divf %172, %173 : vector<8x8xf32>
    %175 = vector.extract_strided_slice %128 {offsets = [0, 2], sizes = [8, 1], strides = [1, 1]} : vector<8x4xf32> to vector<8x1xf32>
    %176 = vector.extract_strided_slice %126 {offsets = [2, 0], sizes = [1, 16], strides = [1, 1]} : vector<4x16xf32> to vector<1x16xf32>
    %177 = vector.broadcast %175 : vector<8x1xf32> to vector<8x16xf32>
    %178 = vector.broadcast %176 : vector<1x16xf32> to vector<8x16xf32>
    %179 = arith.addf %177, %178 : vector<8x16xf32>
    %cst_65 = arith.constant 0.000000e+00 : f32
    %180 = vector.broadcast %cst_65 : f32 to vector<8x16xf32>
    %181 = arith.cmpf oge, %179, %180 : vector<8x16xf32>
    %cst_66 = arith.constant 2.000000e-01 : f32
    %182 = vector.broadcast %cst_66 : f32 to vector<8x16xf32>
    %183 = arith.mulf %182, %179 : vector<8x16xf32>
    %184 = arith.select %181, %179, %183 : vector<8x16xi1>, vector<8x16xf32>
    %185 = arith.addf %184, %119 : vector<8x16xf32>
    %cst_67 = arith.constant dense<0xFF800000> : vector<8xf32>
    %186 = vector.multi_reduction <maximumf>, %185, %cst_67 [1] : vector<8x16xf32> to vector<8xf32>
    %187 = vector.shape_cast %186 : vector<8xf32> to vector<8x1xf32>
    %188 = vector.broadcast %187 : vector<8x1xf32> to vector<8x16xf32>
    %189 = arith.subf %185, %188 : vector<8x16xf32>
    %190 = math.exp %189 : vector<8x16xf32>
    %cst_68 = arith.constant dense<0.000000e+00> : vector<8xf32>
    %191 = vector.multi_reduction <add>, %190, %cst_68 [1] : vector<8x16xf32> to vector<8xf32>
    %192 = vector.shape_cast %191 : vector<8xf32> to vector<8x1xf32>
    %193 = arith.truncf %190 : vector<8x16xf32> to vector<8x16xbf16>
    %194 = vector.extract_strided_slice %124 {offsets = [0, 16], sizes = [16, 8], strides = [1, 1]} : vector<16x32xbf16> to vector<16x8xbf16>
    %cst_69 = arith.constant dense<0.000000e+00> : vector<8x8xf32>
    %195 = tpu.matmul %193, %194, %cst_69 {dimension_numbers = #tpu.dot_dimension_numbers<[1], [0], [0], [1], [0, 0, 1, 1], [], []>} : vector<8x16xbf16>, vector<16x8xbf16>, vector<8x8xf32> -> vector<8x8xf32>
    %196 = vector.broadcast %192 : vector<8x1xf32> to vector<8x8xf32>
    %197 = arith.divf %195, %196 : vector<8x8xf32>
    %198 = vector.extract_strided_slice %128 {offsets = [0, 3], sizes = [8, 1], strides = [1, 1]} : vector<8x4xf32> to vector<8x1xf32>
    %199 = vector.extract_strided_slice %126 {offsets = [3, 0], sizes = [1, 16], strides = [1, 1]} : vector<4x16xf32> to vector<1x16xf32>
    %200 = vector.broadcast %198 : vector<8x1xf32> to vector<8x16xf32>
    %201 = vector.broadcast %199 : vector<1x16xf32> to vector<8x16xf32>
    %202 = arith.addf %200, %201 : vector<8x16xf32>
    %cst_70 = arith.constant 0.000000e+00 : f32
    %203 = vector.broadcast %cst_70 : f32 to vector<8x16xf32>
    %204 = arith.cmpf oge, %202, %203 : vector<8x16xf32>
    %cst_71 = arith.constant 2.000000e-01 : f32
    %205 = vector.broadcast %cst_71 : f32 to vector<8x16xf32>
    %206 = arith.mulf %205, %202 : vector<8x16xf32>
    %207 = arith.select %204, %202, %206 : vector<8x16xi1>, vector<8x16xf32>
    %208 = arith.addf %207, %119 : vector<8x16xf32>
    %cst_72 = arith.constant dense<0xFF800000> : vector<8xf32>
    %209 = vector.multi_reduction <maximumf>, %208, %cst_72 [1] : vector<8x16xf32> to vector<8xf32>
    %210 = vector.shape_cast %209 : vector<8xf32> to vector<8x1xf32>
    %211 = vector.broadcast %210 : vector<8x1xf32> to vector<8x16xf32>
    %212 = arith.subf %208, %211 : vector<8x16xf32>
    %213 = math.exp %212 : vector<8x16xf32>
    %cst_73 = arith.constant dense<0.000000e+00> : vector<8xf32>
    %214 = vector.multi_reduction <add>, %213, %cst_73 [1] : vector<8x16xf32> to vector<8xf32>
    %215 = vector.shape_cast %214 : vector<8xf32> to vector<8x1xf32>
    %216 = arith.truncf %213 : vector<8x16xf32> to vector<8x16xbf16>
    %217 = vector.extract_strided_slice %124 {offsets = [0, 24], sizes = [16, 8], strides = [1, 1]} : vector<16x32xbf16> to vector<16x8xbf16>
    %cst_74 = arith.constant dense<0.000000e+00> : vector<8x8xf32>
    %218 = tpu.matmul %216, %217, %cst_74 {dimension_numbers = #tpu.dot_dimension_numbers<[1], [0], [0], [1], [0, 0, 1, 1], [], []>} : vector<8x16xbf16>, vector<16x8xbf16>, vector<8x8xf32> -> vector<8x8xf32>
    %219 = vector.broadcast %215 : vector<8x1xf32> to vector<8x8xf32>
    %220 = arith.divf %218, %219 : vector<8x8xf32>
    %221 = tpu.concatenate %151, %174, %197, %220 in 1 : vector<8x8xf32>, vector<8x8xf32>, vector<8x8xf32>, vector<8x8xf32> -> vector<8x32xf32>
    %222 = vector.broadcast %120 : vector<8x1xf32> to vector<8x32xf32>
    %223 = arith.mulf %221, %222 : vector<8x32xf32>
    %c0_75 = arith.constant 0 : index
    %c0_76 = arith.constant 0 : index
    %224 = vector.load %arg18[%c0_75, %c0_76] : memref<1x32xf32, #tpu.memory_space<vmem>>, vector<1x32xf32>
    %225 = vector.broadcast %224 : vector<1x32xf32> to vector<8x32xf32>
    %226 = arith.addf %223, %225 : vector<8x32xf32>
    %cst_77 = arith.constant 0.000000e+00 : f32
    %227 = vector.broadcast %cst_77 : f32 to vector<8x32xf32>
    %228 = arith.cmpf ogt, %226, %227 : vector<8x32xf32>
    %cst_78 = arith.constant 0.000000e+00 : f32
    %229 = vector.broadcast %cst_78 : f32 to vector<8x32xf32>
    %230 = arith.minimumf %226, %229 : vector<8x32xf32>
    %231 = math.exp %230 : vector<8x32xf32>
    %cst_79 = arith.constant 1.000000e+00 : f32
    %232 = vector.broadcast %cst_79 : f32 to vector<8x32xf32>
    %233 = arith.subf %231, %232 : vector<8x32xf32>
    %234 = arith.select %228, %226, %233 : vector<8x32xi1>, vector<8x32xf32>
    %c0_80 = arith.constant 0 : index
    %c0_81 = arith.constant 0 : index
    %235 = vector.load %arg10[%c0_80, %c0_81] : memref<4x24xf32, #tpu.memory_space<vmem>>, vector<4x24xf32>
    %c0_82 = arith.constant 0 : index
    %c0_83 = arith.constant 0 : index
    %236 = vector.load %arg4[%c0_82, %c0_83] : memref<8x4xf32, #tpu.memory_space<vmem>>, vector<8x4xf32>
    %c0_84 = arith.constant 0 : index
    %c0_85 = arith.constant 0 : index
    %237 = vector.load %arg7[%c0_84, %c0_85] : memref<8x1xf32, #tpu.memory_space<vmem>>, vector<8x1xf32>
    %238 = arith.truncf %235 : vector<4x24xf32> to vector<4x24xbf16>
    %c0_86 = arith.constant 0 : index
    %c0_87 = arith.constant 0 : index
    %239 = vector.load %arg19[%c0_86, %c0_87] : memref<24x32xbf16, #tpu.memory_space<vmem>>, vector<24x32xbf16>
    %cst_88 = arith.constant dense<0.000000e+00> : vector<4x32xf32>
    %240 = tpu.matmul %238, %239, %cst_88 {dimension_numbers = #tpu.dot_dimension_numbers<[1], [0], [0], [1], [0, 0, 1, 1], [], []>} : vector<4x24xbf16>, vector<24x32xbf16>, vector<4x32xf32> -> vector<4x32xf32>
    %241 = arith.truncf %240 : vector<4x32xf32> to vector<4x32xbf16>
    %c0_89 = arith.constant 0 : index
    %c0_90 = arith.constant 0 : index
    %242 = vector.load %arg20[%c0_89, %c0_90] : memref<4x24xf32, #tpu.memory_space<vmem>>, vector<4x24xf32>
    %cst_91 = arith.constant dense<0.000000e+00> : vector<4x4xf32>
    %243 = tpu.matmul %242, %235, %cst_91 {dimension_numbers = #tpu.dot_dimension_numbers<[1], [1], [0], [0], [0, 0, 1, 0], [], []>} : vector<4x24xf32>, vector<4x24xf32>, vector<4x4xf32> -> vector<4x4xf32>
    %c0_92 = arith.constant 0 : index
    %c0_93 = arith.constant 0 : index
    %244 = vector.load %arg21[%c0_92, %c0_93] : memref<32x4xf32, #tpu.memory_space<vmem>>, vector<32x4xf32>
    %cst_94 = arith.constant dense<0.000000e+00> : vector<8x4xf32>
    %245 = tpu.matmul %0, %244, %cst_94 {dimension_numbers = #tpu.dot_dimension_numbers<[1], [0], [0], [1], [0, 0, 1, 1], [], []>} : vector<8x32xf32>, vector<32x4xf32>, vector<8x4xf32> -> vector<8x4xf32>
    %246 = vector.extract_strided_slice %245 {offsets = [0, 0], sizes = [8, 1], strides = [1, 1]} : vector<8x4xf32> to vector<8x1xf32>
    %247 = vector.extract_strided_slice %243 {offsets = [0, 0], sizes = [1, 4], strides = [1, 1]} : vector<4x4xf32> to vector<1x4xf32>
    %248 = vector.broadcast %246 : vector<8x1xf32> to vector<8x4xf32>
    %249 = vector.broadcast %247 : vector<1x4xf32> to vector<8x4xf32>
    %250 = arith.addf %248, %249 : vector<8x4xf32>
    %cst_95 = arith.constant 0.000000e+00 : f32
    %251 = vector.broadcast %cst_95 : f32 to vector<8x4xf32>
    %252 = arith.cmpf oge, %250, %251 : vector<8x4xf32>
    %cst_96 = arith.constant 2.000000e-01 : f32
    %253 = vector.broadcast %cst_96 : f32 to vector<8x4xf32>
    %254 = arith.mulf %253, %250 : vector<8x4xf32>
    %255 = arith.select %252, %250, %254 : vector<8x4xi1>, vector<8x4xf32>
    %256 = arith.addf %255, %236 : vector<8x4xf32>
    %cst_97 = arith.constant dense<0xFF800000> : vector<8xf32>
    %257 = vector.multi_reduction <maximumf>, %256, %cst_97 [1] : vector<8x4xf32> to vector<8xf32>
    %258 = vector.shape_cast %257 : vector<8xf32> to vector<8x1xf32>
    %259 = vector.broadcast %258 : vector<8x1xf32> to vector<8x4xf32>
    %260 = arith.subf %256, %259 : vector<8x4xf32>
    %261 = math.exp %260 : vector<8x4xf32>
    %cst_98 = arith.constant dense<0.000000e+00> : vector<8xf32>
    %262 = vector.multi_reduction <add>, %261, %cst_98 [1] : vector<8x4xf32> to vector<8xf32>
    %263 = vector.shape_cast %262 : vector<8xf32> to vector<8x1xf32>
    %264 = arith.truncf %261 : vector<8x4xf32> to vector<8x4xbf16>
    %265 = vector.extract_strided_slice %241 {offsets = [0, 0], sizes = [4, 8], strides = [1, 1]} : vector<4x32xbf16> to vector<4x8xbf16>
    %cst_99 = arith.constant dense<0.000000e+00> : vector<8x8xf32>
    %266 = tpu.matmul %264, %265, %cst_99 {dimension_numbers = #tpu.dot_dimension_numbers<[1], [0], [0], [1], [0, 0, 1, 1], [], []>} : vector<8x4xbf16>, vector<4x8xbf16>, vector<8x8xf32> -> vector<8x8xf32>
    %267 = vector.broadcast %263 : vector<8x1xf32> to vector<8x8xf32>
    %268 = arith.divf %266, %267 : vector<8x8xf32>
    %269 = vector.extract_strided_slice %245 {offsets = [0, 1], sizes = [8, 1], strides = [1, 1]} : vector<8x4xf32> to vector<8x1xf32>
    %270 = vector.extract_strided_slice %243 {offsets = [1, 0], sizes = [1, 4], strides = [1, 1]} : vector<4x4xf32> to vector<1x4xf32>
    %271 = vector.broadcast %269 : vector<8x1xf32> to vector<8x4xf32>
    %272 = vector.broadcast %270 : vector<1x4xf32> to vector<8x4xf32>
    %273 = arith.addf %271, %272 : vector<8x4xf32>
    %cst_100 = arith.constant 0.000000e+00 : f32
    %274 = vector.broadcast %cst_100 : f32 to vector<8x4xf32>
    %275 = arith.cmpf oge, %273, %274 : vector<8x4xf32>
    %cst_101 = arith.constant 2.000000e-01 : f32
    %276 = vector.broadcast %cst_101 : f32 to vector<8x4xf32>
    %277 = arith.mulf %276, %273 : vector<8x4xf32>
    %278 = arith.select %275, %273, %277 : vector<8x4xi1>, vector<8x4xf32>
    %279 = arith.addf %278, %236 : vector<8x4xf32>
    %cst_102 = arith.constant dense<0xFF800000> : vector<8xf32>
    %280 = vector.multi_reduction <maximumf>, %279, %cst_102 [1] : vector<8x4xf32> to vector<8xf32>
    %281 = vector.shape_cast %280 : vector<8xf32> to vector<8x1xf32>
    %282 = vector.broadcast %281 : vector<8x1xf32> to vector<8x4xf32>
    %283 = arith.subf %279, %282 : vector<8x4xf32>
    %284 = math.exp %283 : vector<8x4xf32>
    %cst_103 = arith.constant dense<0.000000e+00> : vector<8xf32>
    %285 = vector.multi_reduction <add>, %284, %cst_103 [1] : vector<8x4xf32> to vector<8xf32>
    %286 = vector.shape_cast %285 : vector<8xf32> to vector<8x1xf32>
    %287 = arith.truncf %284 : vector<8x4xf32> to vector<8x4xbf16>
    %288 = vector.extract_strided_slice %241 {offsets = [0, 8], sizes = [4, 8], strides = [1, 1]} : vector<4x32xbf16> to vector<4x8xbf16>
    %cst_104 = arith.constant dense<0.000000e+00> : vector<8x8xf32>
    %289 = tpu.matmul %287, %288, %cst_104 {dimension_numbers = #tpu.dot_dimension_numbers<[1], [0], [0], [1], [0, 0, 1, 1], [], []>} : vector<8x4xbf16>, vector<4x8xbf16>, vector<8x8xf32> -> vector<8x8xf32>
    %290 = vector.broadcast %286 : vector<8x1xf32> to vector<8x8xf32>
    %291 = arith.divf %289, %290 : vector<8x8xf32>
    %292 = vector.extract_strided_slice %245 {offsets = [0, 2], sizes = [8, 1], strides = [1, 1]} : vector<8x4xf32> to vector<8x1xf32>
    %293 = vector.extract_strided_slice %243 {offsets = [2, 0], sizes = [1, 4], strides = [1, 1]} : vector<4x4xf32> to vector<1x4xf32>
    %294 = vector.broadcast %292 : vector<8x1xf32> to vector<8x4xf32>
    %295 = vector.broadcast %293 : vector<1x4xf32> to vector<8x4xf32>
    %296 = arith.addf %294, %295 : vector<8x4xf32>
    %cst_105 = arith.constant 0.000000e+00 : f32
    %297 = vector.broadcast %cst_105 : f32 to vector<8x4xf32>
    %298 = arith.cmpf oge, %296, %297 : vector<8x4xf32>
    %cst_106 = arith.constant 2.000000e-01 : f32
    %299 = vector.broadcast %cst_106 : f32 to vector<8x4xf32>
    %300 = arith.mulf %299, %296 : vector<8x4xf32>
    %301 = arith.select %298, %296, %300 : vector<8x4xi1>, vector<8x4xf32>
    %302 = arith.addf %301, %236 : vector<8x4xf32>
    %cst_107 = arith.constant dense<0xFF800000> : vector<8xf32>
    %303 = vector.multi_reduction <maximumf>, %302, %cst_107 [1] : vector<8x4xf32> to vector<8xf32>
    %304 = vector.shape_cast %303 : vector<8xf32> to vector<8x1xf32>
    %305 = vector.broadcast %304 : vector<8x1xf32> to vector<8x4xf32>
    %306 = arith.subf %302, %305 : vector<8x4xf32>
    %307 = math.exp %306 : vector<8x4xf32>
    %cst_108 = arith.constant dense<0.000000e+00> : vector<8xf32>
    %308 = vector.multi_reduction <add>, %307, %cst_108 [1] : vector<8x4xf32> to vector<8xf32>
    %309 = vector.shape_cast %308 : vector<8xf32> to vector<8x1xf32>
    %310 = arith.truncf %307 : vector<8x4xf32> to vector<8x4xbf16>
    %311 = vector.extract_strided_slice %241 {offsets = [0, 16], sizes = [4, 8], strides = [1, 1]} : vector<4x32xbf16> to vector<4x8xbf16>
    %cst_109 = arith.constant dense<0.000000e+00> : vector<8x8xf32>
    %312 = tpu.matmul %310, %311, %cst_109 {dimension_numbers = #tpu.dot_dimension_numbers<[1], [0], [0], [1], [0, 0, 1, 1], [], []>} : vector<8x4xbf16>, vector<4x8xbf16>, vector<8x8xf32> -> vector<8x8xf32>
    %313 = vector.broadcast %309 : vector<8x1xf32> to vector<8x8xf32>
    %314 = arith.divf %312, %313 : vector<8x8xf32>
    %315 = vector.extract_strided_slice %245 {offsets = [0, 3], sizes = [8, 1], strides = [1, 1]} : vector<8x4xf32> to vector<8x1xf32>
    %316 = vector.extract_strided_slice %243 {offsets = [3, 0], sizes = [1, 4], strides = [1, 1]} : vector<4x4xf32> to vector<1x4xf32>
    %317 = vector.broadcast %315 : vector<8x1xf32> to vector<8x4xf32>
    %318 = vector.broadcast %316 : vector<1x4xf32> to vector<8x4xf32>
    %319 = arith.addf %317, %318 : vector<8x4xf32>
    %cst_110 = arith.constant 0.000000e+00 : f32
    %320 = vector.broadcast %cst_110 : f32 to vector<8x4xf32>
    %321 = arith.cmpf oge, %319, %320 : vector<8x4xf32>
    %cst_111 = arith.constant 2.000000e-01 : f32
    %322 = vector.broadcast %cst_111 : f32 to vector<8x4xf32>
    %323 = arith.mulf %322, %319 : vector<8x4xf32>
    %324 = arith.select %321, %319, %323 : vector<8x4xi1>, vector<8x4xf32>
    %325 = arith.addf %324, %236 : vector<8x4xf32>
    %cst_112 = arith.constant dense<0xFF800000> : vector<8xf32>
    %326 = vector.multi_reduction <maximumf>, %325, %cst_112 [1] : vector<8x4xf32> to vector<8xf32>
    %327 = vector.shape_cast %326 : vector<8xf32> to vector<8x1xf32>
    %328 = vector.broadcast %327 : vector<8x1xf32> to vector<8x4xf32>
    %329 = arith.subf %325, %328 : vector<8x4xf32>
    %330 = math.exp %329 : vector<8x4xf32>
    %cst_113 = arith.constant dense<0.000000e+00> : vector<8xf32>
    %331 = vector.multi_reduction <add>, %330, %cst_113 [1] : vector<8x4xf32> to vector<8xf32>
    %332 = vector.shape_cast %331 : vector<8xf32> to vector<8x1xf32>
    %333 = arith.truncf %330 : vector<8x4xf32> to vector<8x4xbf16>
    %334 = vector.extract_strided_slice %241 {offsets = [0, 24], sizes = [4, 8], strides = [1, 1]} : vector<4x32xbf16> to vector<4x8xbf16>
    %cst_114 = arith.constant dense<0.000000e+00> : vector<8x8xf32>
    %335 = tpu.matmul %333, %334, %cst_114 {dimension_numbers = #tpu.dot_dimension_numbers<[1], [0], [0], [1], [0, 0, 1, 1], [], []>} : vector<8x4xbf16>, vector<4x8xbf16>, vector<8x8xf32> -> vector<8x8xf32>
    %336 = vector.broadcast %332 : vector<8x1xf32> to vector<8x8xf32>
    %337 = arith.divf %335, %336 : vector<8x8xf32>
    %338 = tpu.concatenate %268, %291, %314, %337 in 1 : vector<8x8xf32>, vector<8x8xf32>, vector<8x8xf32>, vector<8x8xf32> -> vector<8x32xf32>
    %339 = vector.broadcast %237 : vector<8x1xf32> to vector<8x32xf32>
    %340 = arith.mulf %338, %339 : vector<8x32xf32>
    %c0_115 = arith.constant 0 : index
    %c0_116 = arith.constant 0 : index
    %341 = vector.load %arg22[%c0_115, %c0_116] : memref<1x32xf32, #tpu.memory_space<vmem>>, vector<1x32xf32>
    %342 = vector.broadcast %341 : vector<1x32xf32> to vector<8x32xf32>
    %343 = arith.addf %340, %342 : vector<8x32xf32>
    %cst_117 = arith.constant 0.000000e+00 : f32
    %344 = vector.broadcast %cst_117 : f32 to vector<8x32xf32>
    %345 = arith.cmpf ogt, %343, %344 : vector<8x32xf32>
    %cst_118 = arith.constant 0.000000e+00 : f32
    %346 = vector.broadcast %cst_118 : f32 to vector<8x32xf32>
    %347 = arith.minimumf %343, %346 : vector<8x32xf32>
    %348 = math.exp %347 : vector<8x32xf32>
    %cst_119 = arith.constant 1.000000e+00 : f32
    %349 = vector.broadcast %cst_119 : f32 to vector<8x32xf32>
    %350 = arith.subf %348, %349 : vector<8x32xf32>
    %351 = arith.select %345, %343, %350 : vector<8x32xi1>, vector<8x32xf32>
    %c0_120 = arith.constant 0 : index
    %c0_121 = arith.constant 0 : index
    %352 = memref.load %arg25[%c0_120, %c0_121] : memref<1x1xf32, #tpu.memory_space<smem>>
    %c0_122 = arith.constant 0 : index
    %c0_123 = arith.constant 0 : index
    %353 = vector.load %arg23[%c0_122, %c0_123] : memref<1x32xf32, #tpu.memory_space<vmem>>, vector<1x32xf32>
    %354 = vector.broadcast %353 : vector<1x32xf32> to vector<8x32xf32>
    %355 = arith.mulf %117, %354 : vector<8x32xf32>
    %cst_124 = arith.constant dense<0.000000e+00> : vector<8xf32>
    %356 = vector.multi_reduction <add>, %355, %cst_124 [1] : vector<8x32xf32> to vector<8xf32>
    %357 = vector.shape_cast %356 : vector<8xf32> to vector<8x1xf32>
    %c0_125 = arith.constant 0 : index
    %c0_126 = arith.constant 0 : index
    %358 = vector.load %arg24[%c0_125, %c0_126] : memref<1x32xf32, #tpu.memory_space<vmem>>, vector<1x32xf32>
    %359 = vector.broadcast %358 : vector<1x32xf32> to vector<8x32xf32>
    %360 = arith.mulf %351, %359 : vector<8x32xf32>
    %cst_127 = arith.constant dense<0.000000e+00> : vector<8xf32>
    %361 = vector.multi_reduction <add>, %360, %cst_127 [1] : vector<8x32xf32> to vector<8xf32>
    %362 = vector.shape_cast %361 : vector<8xf32> to vector<8x1xf32>
    %363 = arith.addf %357, %362 : vector<8x1xf32>
    %364 = vector.broadcast %352 : f32 to vector<8x1xf32>
    %365 = arith.addf %363, %364 : vector<8x1xf32>
    %cst_128 = arith.constant -3.000000e+01 : f32
    %cst_129 = arith.constant 3.000000e+01 : f32
    %366 = vector.broadcast %cst_128 : f32 to vector<8x1xf32>
    %367 = arith.maximumf %366, %365 : vector<8x1xf32>
    %368 = vector.broadcast %cst_129 : f32 to vector<8x1xf32>
    %369 = arith.minimumf %368, %367 : vector<8x1xf32>
    %cst_130 = arith.constant 0.000000e+00 : f32
    %370 = vector.broadcast %cst_130 : f32 to vector<8x1xf32>
    %371 = arith.subf %370, %369 : vector<8x1xf32>
    %372 = math.exp %371 : vector<8x1xf32>
    %cst_131 = arith.constant 1.000000e+00 : f32
    %373 = vector.broadcast %cst_131 : f32 to vector<8x1xf32>
    %374 = arith.addf %373, %372 : vector<8x1xf32>
    %cst_132 = arith.constant 1.000000e+00 : f32
    %375 = vector.broadcast %cst_132 : f32 to vector<8x1xf32>
    %376 = arith.divf %375, %374 : vector<8x1xf32>
    %377 = vector.broadcast %376 : vector<8x1xf32> to vector<8x32xf32>
    %378 = arith.mulf %377, %117 : vector<8x32xf32>
    %cst_133 = arith.constant 1.000000e+00 : f32
    %379 = vector.broadcast %cst_133 : f32 to vector<8x1xf32>
    %380 = arith.subf %379, %376 : vector<8x1xf32>
    %381 = vector.broadcast %380 : vector<8x1xf32> to vector<8x32xf32>
    %382 = arith.mulf %381, %351 : vector<8x32xf32>
    %383 = arith.addf %378, %382 : vector<8x32xf32>
    %c0_134 = arith.constant 0 : index
    %c0_135 = arith.constant 0 : index
    %384 = memref.load %arg28[%c0_134, %c0_135] : memref<1x1xf32, #tpu.memory_space<smem>>
    %c0_136 = arith.constant 0 : index
    %c0_137 = arith.constant 0 : index
    %385 = vector.load %arg26[%c0_136, %c0_137] : memref<1x32xf32, #tpu.memory_space<vmem>>, vector<1x32xf32>
    %386 = vector.broadcast %385 : vector<1x32xf32> to vector<8x32xf32>
    %387 = arith.mulf %383, %386 : vector<8x32xf32>
    %cst_138 = arith.constant dense<0.000000e+00> : vector<8xf32>
    %388 = vector.multi_reduction <add>, %387, %cst_138 [1] : vector<8x32xf32> to vector<8xf32>
    %389 = vector.shape_cast %388 : vector<8xf32> to vector<8x1xf32>
    %c0_139 = arith.constant 0 : index
    %c0_140 = arith.constant 0 : index
    %390 = vector.load %arg27[%c0_139, %c0_140] : memref<1x32xf32, #tpu.memory_space<vmem>>, vector<1x32xf32>
    %391 = vector.broadcast %390 : vector<1x32xf32> to vector<8x32xf32>
    %392 = arith.mulf %234, %391 : vector<8x32xf32>
    %cst_141 = arith.constant dense<0.000000e+00> : vector<8xf32>
    %393 = vector.multi_reduction <add>, %392, %cst_141 [1] : vector<8x32xf32> to vector<8xf32>
    %394 = vector.shape_cast %393 : vector<8xf32> to vector<8x1xf32>
    %395 = arith.addf %389, %394 : vector<8x1xf32>
    %396 = vector.broadcast %384 : f32 to vector<8x1xf32>
    %397 = arith.addf %395, %396 : vector<8x1xf32>
    %cst_142 = arith.constant -3.000000e+01 : f32
    %cst_143 = arith.constant 3.000000e+01 : f32
    %398 = vector.broadcast %cst_142 : f32 to vector<8x1xf32>
    %399 = arith.maximumf %398, %397 : vector<8x1xf32>
    %400 = vector.broadcast %cst_143 : f32 to vector<8x1xf32>
    %401 = arith.minimumf %400, %399 : vector<8x1xf32>
    %cst_144 = arith.constant 0.000000e+00 : f32
    %402 = vector.broadcast %cst_144 : f32 to vector<8x1xf32>
    %403 = arith.subf %402, %401 : vector<8x1xf32>
    %404 = math.exp %403 : vector<8x1xf32>
    %cst_145 = arith.constant 1.000000e+00 : f32
    %405 = vector.broadcast %cst_145 : f32 to vector<8x1xf32>
    %406 = arith.addf %405, %404 : vector<8x1xf32>
    %cst_146 = arith.constant 1.000000e+00 : f32
    %407 = vector.broadcast %cst_146 : f32 to vector<8x1xf32>
    %408 = arith.divf %407, %406 : vector<8x1xf32>
    %409 = vector.broadcast %408 : vector<8x1xf32> to vector<8x32xf32>
    %410 = arith.mulf %409, %383 : vector<8x32xf32>
    %cst_147 = arith.constant 1.000000e+00 : f32
    %411 = vector.broadcast %cst_147 : f32 to vector<8x1xf32>
    %412 = arith.subf %411, %408 : vector<8x1xf32>
    %413 = vector.broadcast %412 : vector<8x1xf32> to vector<8x32xf32>
    %414 = arith.mulf %413, %234 : vector<8x32xf32>
    %415 = arith.addf %410, %414 : vector<8x32xf32>
    %416 = arith.addf %0, %415 : vector<8x32xf32>
    %417 = arith.truncf %416 : vector<8x32xf32> to vector<8x32xbf16>
    %c0_148 = arith.constant 0 : index
    %c0_149 = arith.constant 0 : index
    %418 = vector.load %arg29[%c0_148, %c0_149] : memref<32x64xbf16, #tpu.memory_space<vmem>>, vector<32x64xbf16>
    %cst_150 = arith.constant dense<0.000000e+00> : vector<8x64xf32>
    %419 = tpu.matmul %417, %418, %cst_150 {dimension_numbers = #tpu.dot_dimension_numbers<[1], [0], [0], [1], [0, 0, 1, 1], [], []>} : vector<8x32xbf16>, vector<32x64xbf16>, vector<8x64xf32> -> vector<8x64xf32>
    %c0_151 = arith.constant 0 : index
    %c0_152 = arith.constant 0 : index
    %420 = vector.load %arg30[%c0_151, %c0_152] : memref<1x64xf32, #tpu.memory_space<vmem>>, vector<1x64xf32>
    %421 = vector.broadcast %420 : vector<1x64xf32> to vector<8x64xf32>
    %422 = arith.addf %419, %421 : vector<8x64xf32>
    %cst_153 = arith.constant 0.000000e+00 : f32
    %423 = vector.broadcast %cst_153 : f32 to vector<8x64xf32>
    %424 = arith.maximumf %422, %423 : vector<8x64xf32>
    %425 = arith.truncf %424 : vector<8x64xf32> to vector<8x64xbf16>
    %c0_154 = arith.constant 0 : index
    %c0_155 = arith.constant 0 : index
    %426 = vector.load %arg31[%c0_154, %c0_155] : memref<64x32xbf16, #tpu.memory_space<vmem>>, vector<64x32xbf16>
    %cst_156 = arith.constant dense<0.000000e+00> : vector<8x32xf32>
    %427 = tpu.matmul %425, %426, %cst_156 {dimension_numbers = #tpu.dot_dimension_numbers<[1], [0], [0], [1], [0, 0, 1, 1], [], []>} : vector<8x64xbf16>, vector<64x32xbf16>, vector<8x32xf32> -> vector<8x32xf32>
    %c0_157 = arith.constant 0 : index
    %c0_158 = arith.constant 0 : index
    %428 = vector.load %arg32[%c0_157, %c0_158] : memref<1x32xf32, #tpu.memory_space<vmem>>, vector<1x32xf32>
    %429 = vector.broadcast %428 : vector<1x32xf32> to vector<8x32xf32>
    %430 = arith.addf %427, %429 : vector<8x32xf32>
    %c0_159 = arith.constant 0 : index
    %c0_160 = arith.constant 0 : index
    %431 = vector.load %arg33[%c0_159, %c0_160] : memref<8x32xf32, #tpu.memory_space<vmem>>, vector<8x32xf32>
    tpu.vector_store %arg33[%c0_159, %c0_160], %430 {strides = array<i32>} : memref<8x32xf32, #tpu.memory_space<vmem>>, vector<8x32xf32>,
    return
  }
  func.func @transform_0(%arg0: i32) -> (i32, i32) {
    %c0_i32 = arith.constant 0 : i32
    %c0_i32_0 = arith.constant 0 : i32
    return %arg0, %c0_i32 : i32, i32
  }
  func.func @transform_1(%arg0: i32) -> (i32, i32) {
    %c0_i32 = arith.constant 0 : i32
    %c0_i32_0 = arith.constant 0 : i32
    return %arg0, %c0_i32 : i32, i32
  }
  func.func @transform_2(%arg0: i32) -> (i32, i32) {
    %c0_i32 = arith.constant 0 : i32
    %c0_i32_0 = arith.constant 0 : i32
    return %arg0, %c0_i32 : i32, i32
  }
  func.func @transform_3(%arg0: i32) -> (i32, i32) {
    %c0_i32 = arith.constant 0 : i32
    %c0_i32_0 = arith.constant 0 : i32
    return %arg0, %c0_i32 : i32, i32
  }
  func.func @transform_4(%arg0: i32) -> (i32, i32) {
    %c0_i32 = arith.constant 0 : i32
    %c0_i32_0 = arith.constant 0 : i32
    return %arg0, %c0_i32 : i32, i32
  }
  func.func @transform_5(%arg0: i32) -> (i32, i32) {
    %c0_i32 = arith.constant 0 : i32
    %c0_i32_0 = arith.constant 0 : i32
    return %arg0, %c0_i32 : i32, i32
  }
  func.func @transform_6(%arg0: i32) -> (i32, i32) {
    %c0_i32 = arith.constant 0 : i32
    %c0_i32_0 = arith.constant 0 : i32
    return %arg0, %c0_i32 : i32, i32
  }
  func.func @transform_7(%arg0: i32) -> (i32, i32) {
    %c0_i32 = arith.constant 0 : i32
    %c0_i32_0 = arith.constant 0 : i32
    %c0_i32_1 = arith.constant 0 : i32
    return %c0_i32, %c0_i32_0 : i32, i32
  }
  func.func @transform_8(%arg0: i32) -> (i32, i32) {
    %c0_i32 = arith.constant 0 : i32
    %c0_i32_0 = arith.constant 0 : i32
    %c0_i32_1 = arith.constant 0 : i32
    return %c0_i32, %c0_i32_0 : i32, i32
  }
  func.func @transform_9(%arg0: i32) -> (i32, i32) {
    %c0_i32 = arith.constant 0 : i32
    %c0_i32_0 = arith.constant 0 : i32
    %c0_i32_1 = arith.constant 0 : i32
    return %c0_i32, %c0_i32_0 : i32, i32
  }
  func.func @transform_10(%arg0: i32) -> (i32, i32) {
    %c0_i32 = arith.constant 0 : i32
    %c0_i32_0 = arith.constant 0 : i32
    %c0_i32_1 = arith.constant 0 : i32
    return %c0_i32, %c0_i32_0 : i32, i32
  }
  func.func @transform_11(%arg0: i32) -> (i32, i32) {
    %c0_i32 = arith.constant 0 : i32
    %c0_i32_0 = arith.constant 0 : i32
    %c0_i32_1 = arith.constant 0 : i32
    return %c0_i32, %c0_i32_0 : i32, i32
  }
  func.func @transform_12(%arg0: i32) -> (i32, i32) {
    %c0_i32 = arith.constant 0 : i32
    %c0_i32_0 = arith.constant 0 : i32
    %c0_i32_1 = arith.constant 0 : i32
    return %c0_i32, %c0_i32_0 : i32, i32
  }
  func.func @transform_13(%arg0: i32) -> (i32, i32) {
    %c0_i32 = arith.constant 0 : i32
    %c0_i32_0 = arith.constant 0 : i32
    %c0_i32_1 = arith.constant 0 : i32
    return %c0_i32, %c0_i32_0 : i32, i32
  }
  func.func @transform_14(%arg0: i32) -> (i32, i32) {
    %c0_i32 = arith.constant 0 : i32
    %c0_i32_0 = arith.constant 0 : i32
    %c0_i32_1 = arith.constant 0 : i32
    return %c0_i32, %c0_i32_0 : i32, i32
  }
  func.func @transform_15(%arg0: i32) -> (i32, i32) {
    %c0_i32 = arith.constant 0 : i32
    %c0_i32_0 = arith.constant 0 : i32
    %c0_i32_1 = arith.constant 0 : i32
    return %c0_i32, %c0_i32_0 : i32, i32
  }
  func.func @transform_16(%arg0: i32) -> (i32, i32) {
    %c0_i32 = arith.constant 0 : i32
    %c0_i32_0 = arith.constant 0 : i32
    %c0_i32_1 = arith.constant 0 : i32
    return %c0_i32, %c0_i32_0 : i32, i32
  }
  func.func @transform_17(%arg0: i32) -> (i32, i32) {
    %c0_i32 = arith.constant 0 : i32
    %c0_i32_0 = arith.constant 0 : i32
    %c0_i32_1 = arith.constant 0 : i32
    return %c0_i32, %c0_i32_0 : i32, i32
  }
  func.func @transform_18(%arg0: i32) -> (i32, i32) {
    %c0_i32 = arith.constant 0 : i32
    %c0_i32_0 = arith.constant 0 : i32
    %c0_i32_1 = arith.constant 0 : i32
    return %c0_i32, %c0_i32_0 : i32, i32
  }
  func.func @transform_19(%arg0: i32) -> (i32, i32) {
    %c0_i32 = arith.constant 0 : i32
    %c0_i32_0 = arith.constant 0 : i32
    %c0_i32_1 = arith.constant 0 : i32
    return %c0_i32, %c0_i32_0 : i32, i32
  }
  func.func @transform_20(%arg0: i32) -> (i32, i32) {
    %c0_i32 = arith.constant 0 : i32
    %c0_i32_0 = arith.constant 0 : i32
    %c0_i32_1 = arith.constant 0 : i32
    return %c0_i32, %c0_i32_0 : i32, i32
  }
  func.func @transform_21(%arg0: i32) -> (i32, i32) {
    %c0_i32 = arith.constant 0 : i32
    %c0_i32_0 = arith.constant 0 : i32
    %c0_i32_1 = arith.constant 0 : i32
    return %c0_i32, %c0_i32_0 : i32, i32
  }
  func.func @transform_22(%arg0: i32) -> (i32, i32) {
    %c0_i32 = arith.constant 0 : i32
    %c0_i32_0 = arith.constant 0 : i32
    %c0_i32_1 = arith.constant 0 : i32
    return %c0_i32, %c0_i32_0 : i32, i32
  }
  func.func @transform_23(%arg0: i32) -> (i32, i32) {
    %c0_i32 = arith.constant 0 : i32
    %c0_i32_0 = arith.constant 0 : i32
    %c0_i32_1 = arith.constant 0 : i32
    return %c0_i32, %c0_i32_0 : i32, i32
  }
  func.func @transform_24(%arg0: i32) -> (i32, i32) {
    %c0_i32 = arith.constant 0 : i32
    %c0_i32_0 = arith.constant 0 : i32
    %c0_i32_1 = arith.constant 0 : i32
    return %c0_i32, %c0_i32_0 : i32, i32
  }
  func.func @transform_25(%arg0: i32) -> (i32, i32) {
    %c0_i32 = arith.constant 0 : i32
    %c0_i32_0 = arith.constant 0 : i32
    %c0_i32_1 = arith.constant 0 : i32
    return %c0_i32, %c0_i32_0 : i32, i32
  }
  func.func @transform_26(%arg0: i32) -> (i32, i32) {
    %c0_i32 = arith.constant 0 : i32
    %c0_i32_0 = arith.constant 0 : i32
    %c0_i32_1 = arith.constant 0 : i32
    return %c0_i32, %c0_i32_0 : i32, i32
  }
  func.func @transform_27(%arg0: i32) -> (i32, i32) {
    %c0_i32 = arith.constant 0 : i32
    %c0_i32_0 = arith.constant 0 : i32
    %c0_i32_1 = arith.constant 0 : i32
    return %c0_i32, %c0_i32_0 : i32, i32
  }
  func.func @transform_28(%arg0: i32) -> (i32, i32) {
    %c0_i32 = arith.constant 0 : i32
    %c0_i32_0 = arith.constant 0 : i32
    %c0_i32_1 = arith.constant 0 : i32
    return %c0_i32, %c0_i32_0 : i32, i32
  }
  func.func @transform_29(%arg0: i32) -> (i32, i32) {
    %c0_i32 = arith.constant 0 : i32
    %c0_i32_0 = arith.constant 0 : i32
    %c0_i32_1 = arith.constant 0 : i32
    return %c0_i32, %c0_i32_0 : i32, i32
  }
  func.func @transform_30(%arg0: i32) -> (i32, i32) {
    %c0_i32 = arith.constant 0 : i32
    %c0_i32_0 = arith.constant 0 : i32
    %c0_i32_1 = arith.constant 0 : i32
    return %c0_i32, %c0_i32_0 : i32, i32
  }
  func.func @transform_31(%arg0: i32) -> (i32, i32) {
    %c0_i32 = arith.constant 0 : i32
    %c0_i32_0 = arith.constant 0 : i32
    %c0_i32_1 = arith.constant 0 : i32
    return %c0_i32, %c0_i32_0 : i32, i32
  }
  func.func @transform_32(%arg0: i32) -> (i32, i32) {
    %c0_i32 = arith.constant 0 : i32
    %c0_i32_0 = arith.constant 0 : i32
    return %arg0, %c0_i32 : i32, i32
  }
}

</mosaic_0001>

<bundles_post_ra>
// kernel: tpu_custom_call.1
= control target key start
LH: loop header
LB: loop body
LE: loop exit
PB: predicated region body
PF: predicated region fallthrough
CT: control target
= control target key end

     0   :  { %s2883_s6 = smov 1   ;;  %s2884_s10 = smov 2   ;;  %s3471_s0 = inlined_call_operand.smem [shape: u32[33], index: -1, kind: input, shape index: {}] }
   0x1   :  { %s2933_s5 = sld [smem:[%s3471_s0]]   ;;  %s2885_s14 = smov 3  }
   0x2   :  { %s2938_s9 = sld [smem:[%s3471_s0 + %s2883_s6]]   ;;  %s2886_s18 = smov 4  }
   0x3   :  { %s2943_s13 = sld [smem:[%s3471_s0 + %s2884_s10]]   ;;  %s2887_s22 = smov 5  }
   0x4   :  { %s2948_s17 = sld [smem:[%s3471_s0 + %s2885_s14]]   ;;  %s2888_s26 = smov 6  }
   0x5   :  { %s2953_s21 = sld [smem:[%s3471_s0 + %s2886_s18]]   ;;  %s2889_s30 = smov 7  }
   0x6   :  { %s2958_s25 = sld [smem:[%s3471_s0 + %s2887_s22]]   ;;  %s2890_s4 = smov 8  }
   0x7   :  { %3482 = sst [smem:[#allocation7_spill]] %s2933_s5  ;;  %s2891_s10 = smov 9  }
   0x8   :  { %3483 = sst [smem:[#allocation8_spill]] %s2938_s9  ;;  %s2892_s15 = smov 10  }
   0x9   :  { %s2963_s29 = sld [smem:[%s3471_s0 + %s2888_s26]]   ;;  %s2893_s20 = smov 11  }
   0xa   :  { %3484 = sst [smem:[#allocation9_spill]] %s2948_s17  ;;  %s2894_s26 = smov 12  }
   0xb   :  { %3485 = sst [smem:[#allocation10_spill]] %s2953_s21  ;;  %s2895_s1 = smov 13  }
   0xc   :  { %3486 = sst [smem:[#allocation11_spill]] %s2958_s25  ;;  %s2896_s7 = smov 14  }
   0xd   :  { %s2968_s3 = sld [smem:[%s3471_s0 + %s2889_s30]]   ;;  %s2898_s22 = smov 16  }
   0xe   :  { %s2973_s8 = sld [smem:[%s3471_s0 + %s2890_s4]]   ;;  %s2899_s28 = smov 17  }
   0xf   :  { %3487 = sst [smem:[#allocation12_spill]] %s2963_s29  ;;  %s2909_s16 = smov 27  }
  0x10   :  { %s2978_s14 = sld [smem:[%s3471_s0 + %s2891_s10]]   ;;  %s2908_s10 = smov 26  }
  0x11   :  { %s2983_s19 = sld [smem:[%s3471_s0 + %s2892_s15]]   ;;  %s2897_s15 = smov 15  }
  0x12   :  { %s2988_s24 = sld [smem:[%s3471_s0 + %s2893_s20]]  }
  0x13   :  { %3488 = sst [smem:[#allocation13_spill]] %s2968_s3 }
  0x14   :  { %3489 = sst [smem:[#allocation14_spill]] %s2973_s8 }
  0x15   :  { %s2993_s30 = sld [smem:[%s3471_s0 + %s2894_s26]]  }
  0x16   :  { %3490 = sst [smem:[#allocation15_spill]] %s2978_s14 }
  0x17   :  { %s2998_s6 = sld [smem:[%s3471_s0 + %s2895_s1]]   ;;  %s2907_s1 = smov 25  }
  0x18   :  { %s3003_s12 = sld [smem:[%s3471_s0 + %s2896_s7]]   ;;  %s2900_s7 = smov 18  }
  0x19   :  { %s3008_s20 = sld [smem:[%s3471_s0 + %s2897_s15]]   ;;  %s2901_s15 = smov 19  }
  0x1a   :  { %s3013_s27 = sld [smem:[%s3471_s0 + %s2898_s22]]   ;;  %s2902_s22 = smov 20  }
  0x1b   :  { %s3018_s4 = sld [smem:[%s3471_s0 + %s2899_s28]]   ;;  %s2903_s28 = smov 21  }
  0x1c   :  { %s3023_s25 = sld [smem:[%s3471_s0 + %s2900_s7]]   ;;  %s2904_s7 = smov 22  }
  0x1d   :  { %3491 = sst [smem:[#allocation16_spill]] %s2998_s6 }
  0x1e   :  { %s3028_s6 = sld [smem:[%s3471_s0 + %s2901_s15]]   ;;  %s2905_s15 = smov 23  }
  0x1f   :  { %s3033_s21 = sld [smem:[%s3471_s0 + %s2902_s22]]   ;;  %s2906_s22 = smov 24  }
  0x20   :  { %s3043_s29 = sld [smem:[%s3471_s0 + %s2904_s7]]   ;;  %s2912_s7 = smov 30  }
  0x21   :  { %3492 = sst [smem:[#allocation17_spill]] %s3018_s4 }
  0x22   :  { %3493 = sst [smem:[#allocation18_spill]] %s3023_s25 }
  0x23   :  { %s3038_s4 = sld [smem:[%s3471_s0 + %s2903_s28]]   ;;  %s2911_s28 = smov 29  }
  0x24   :  { %3494 = sst [smem:[#allocation19_spill]] %s3028_s6  ;;  %s2910_s6 = smov 28  }
  0x25   :  { %s3048_s17 = sld [smem:[%s3471_s0 + %s2905_s15]]   ;;  %s2913_s15 = smov 31  }
  0x26   :  { %3496 = sst [smem:[#allocation21_spill]] %s3043_s29 }
  0x27   :  { %s2531_s25 = sld [smem:[%s3471_s0 + %s2906_s22]]  }
  0x28   :  { %s3061_s29 = sld [smem:[%s3471_s0 + %s2908_s10]]  }
  0x29   :  { %3495 = sst [smem:[#allocation20_spill]] %s3038_s4 }
  0x2a   :  { %s3056_s4 = sld [smem:[%s3471_s0 + %s2907_s1]]  }
  0x2b   :  { %3497 = sst [smem:[#allocation22_spill]] %s3048_s17 }
  0x2c   :  { %s2534_s17 = sld [smem:[%s3471_s0 + %s2909_s16]]  }
  0x2d   :  { %s3069_s26 = sld [smem:[%s3471_s0 + %s2910_s6]]   ;;  %s2914_s6 = smov 32  }
  0x2e   :  { %3499 = sst [smem:[#allocation24_spill]] %s3061_s29 }
  0x2f   :  { %s3079_s29 = sld [smem:[%s3471_s0 + %s2912_s7]]  }
  0x30   :  { %3498 = sst [smem:[#allocation23_spill]] %s3056_s4 }
  0x31   :  { %s3074_s4 = sld [smem:[%s3471_s0 + %s2911_s28]]  }
  0x32   :  { %s3084_s14 = sld [smem:[%s3471_s0 + %s2913_s15]]  }
  0x33   :  { %3500 = sst [smem:[#allocation25_spill]] %s3069_s26 }
  0x34   :  { %s3089_s26 = sld [smem:[%s3471_s0 + %s2914_s6]]  }
  0x35   :  { %70 = sst [smem:[#allocation2]] %s2531_s25 }
  0x36   :  { %71 = sst [smem:[#allocation3]] %s2534_s17 }
  0x37   :  { %3501 = sst [smem:[#allocation26_spill]] %s3074_s4 }
  0x38   :  { %72 = vsyncpa [#allocation5], 0 }
  0x39   :  { %74 = vsyncpa [#allocation5 + $0x1], 0  ;;  %s3091_s28 = smov 0   ;;  %s3093_s1 = smov 0  }
  0x3a   :  { %s3095_s2 = smov 0   ;;  %s3097_s7 = smov 0  }
  0x3b LB: > { %s3502_s8 = sld [smem:[#allocation14_spill]]  ;;  %s3112_s0 = sadd.s32 4294967295, %s2881_s7   ;;  %s2873_s1 = sphi %s3093_s1, %s3528_s1   ;;  %s2869_s28 = sphi %s3091_s28, %s3527_s28   ;;  %s2881_s7 = sphi %s3097_s7, %s3530_s7   ;;  %s2877_s2 = sphi %s3095_s2, %s3529_s2  }
  0x3c   : > { %s3503_s3 = sld [smem:[#allocation13_spill]]  ;;  %s2541_s17 = sadd.s32 4294967294, %s2881_s7  }
  0x3d   : > { %s3116_s25 = sadd.s32 1, %s2881_s7   ;;  %s794_s10 = sadd.s32 1, %s2877_s2 }
  0x3e   : > { %s791_s11 = ssub.s32 %s2881_s7, %s3116_s25  ;;  %p804_p0 = scmp.ne.s32.totalorder %s2877_s2, %s2873_s1 }
  0x3f   : > { %p792_p1 = scmp.eq.s32.totalorder %s791_s11, 0  ;;  %p805_p2 = scmp.eq.s32.totalorder %s3112_s0, 1 }
  0x40   : > { %p810_p3 = scmp.ne.s32.totalorder %s2873_s1, %s2869_s28  ;;  %p811_p4 = scmp.eq.s32.totalorder %s2541_s17, 1 }
  0x41   : > { %s3127_s15 = scalar_select %p792_p1, %s2877_s2, %s794_s10  }
  0x42   : > { %p3129_p5 = por %p805_p2, %p804_p0  ;;  %p3133_p6 = por %p811_p4, %p810_p3 }
  0x43   : > { %p2544_p7 = scmp.ge.s32.totalorder %s2881_s7, 1  ;;  %p953_p8 = scmp.lt.s32.totalorder %s2881_s7, 3 }
  0x45   : > { %p954_p9 = pnand %p2544_p7, %p953_p8 }
  0x46   : > { %p1058_p10 = scmp.lt.s32.totalorder (!%p954_p9), %s3112_s0, 1  ;;  %s3506_s5 = sld [smem:[#allocation7_spill]] (!%p954_p9) }
  0x47   : > { %957 = sbr.rel (%p954_p9) target bundleno = 2174 (0x87e), region = 148  ;;  %s3475_s17 = smov (!%p954_p9), 104  }
  0x48   : > { %s3507_s9 = sld [smem:[#allocation8_spill]] (!%p954_p9)  ;;  %s3474_s11 = smov (!%p954_p9), 120  }
  0x49   : > { %s3526_s4 = sld [smem:[#allocation26_spill]] (!%p954_p9) }
  0x4c   : > { %v1189_v0 = vld [vmem:[%s2993_s30 + $0x18] sm:$0xff]  ;;  %v1188_v1 = vld [vmem:[%s2993_s30 + $0x10] sm:$0xff]  ;;  %v1187_v3 = vld [vmem:[%s2993_s30 + $0x8] sm:$0xff]  ;;  %s1059_s6 = scalar_select %p1058_p10, %s3112_s0, 1  ;;  %v2915_v4 = vmov 1   ;;  %v2916_v5 = vmov 0  }
  0x4d   : > { %1206 = vmatpush.msra.mxu2 %v1189_v0  ;;  %v2643_v2 = vld [vmem:[%s2983_s19 + $0x10] sm:$0xff]  ;;  %2736 = vset.pattern.permute.xlu1 %v2915_v4  ;;  %vm1190_vm0 = vcmask 261120   ;;  %v2642_v6 = vld [vmem:[%s2983_s19 + $0x8] sm:$0xff]  ;;  %vm1120_vm1 = vcmask 392192   ;;  %v1091_v7 = vld [vmem:[%s3503_s3 + $0x18] sm:$0xff]  ;;  %v2917_v21 = vmov 3  }
  0x4e   : > { %2734 = vset.pattern.permute.xlu0 %v2916_v5  ;;  %1132 = vmatpush.bf16.msra.mxu0 %v2643_v2  ;;  %v1186_v8 = vld [vmem:[%s2993_s30] sm:$0xff]  ;;  %s3150_s23 = sshll.u32 %s1059_s6, 3  ;;  %v1089_v11 = vld [vmem:[%s3503_s3 + $0x8] sm:$0xff]  ;;  %v1090_v13 = vld [vmem:[%s3503_s3 + $0x10] sm:$0xff]  ;;  %v2919_v33 = vmov 2   ;;  %s2921_s6 = smov 112  }
  0x4f   : > { %1207 = vmatpush.msra.mxu2 %v1188_v1  ;;  %2567 = vmatpush.xpose.msk.msra.mxu1 %vm1120_vm1, %v1091_v7  ;;  %s3155_s22 = scalar_lea.vmem %s3506_s5, %s3150_s23  ;;  %v2641_v9 = vld [vmem:[%s2983_s19] sm:$0xff]  ;;  %v1095_v16 = vpack.c.bf16 %v1091_v7, %v1090_v13  ;;  %s1065_s10 = scalar_lea.vmem %s3507_s9, %s3150_s23  ;;  %vm1463_vm7 = vcmask 130048   ;;  %vm1465_vm10 = vcmask 195584   ;;  %vm1849_vm11 = vcmask 1043456  }
  0x50   : > { %v1088_v10 = vld [vmem:[%s3503_s3] sm:$0xff]  ;;  %2737 = vset.pattern.permute.xlu2 %v2919_v33  ;;  %vm1929_vm14 = vcmask 31744   ;;  %s2924_s3 = smov 24  }
  0x51   : > { %1208 = vmatpush.msra.mxu2 %v1187_v3  ;;  %v3161_v12 = vld [vmem:[%s3155_s22] sm:$0xff]  ;;  %v1094_v14 = vpack.c.bf16 %v1089_v11, %v1088_v10 }
  0x52   : > { %1133 = vmatpush.bf16.msra.mxu0 %v2642_v6  ;;  %v1150_v15 = vld [vmem:[%s2988_s24] sm:$0xf]  ;;  %v1557_v6 = vld [vmem:[%s3013_s27 + $0x18] sm:$0xff] }
  0x53   : > { %1209 = vmatpush.msra.mxu2 %v1186_v8  ;;  %2568 = vmatpush.xpose.msk.msra.mxu1 %vm1120_vm1, %v1090_v13  ;;  %v3191_v41 = vld [vmem:[%s1065_s10] sm:$0xff]  ;;  %v1556_v8 = vld [vmem:[%s3013_s27 + $0x10] sm:$0xff]  ;;  %s1069_s10 = scalar_lea.vmem %s2943_s13, %s3150_s23 }
  0x54   : > { %2572 = vmatmul.msk.f32.vlgmr.msra.gmra.mxu2 %vm1190_vm0, %v3161_v12  ;;  %v1554_v13 = vld [vmem:[%s3013_s27] sm:$0xff] }
  0x56   : > { %1134 = vmatpush.bf16.msra.mxu0 %v2641_v9 }
  0x57   : > { %2569 = vmatpush.xpose.msk.msra.mxu1 %vm1120_vm1, %v1089_v11 }
  0x59   : > { %2565 = vmatmul.msk.bf16.vlgmr.msra.gmra.mxu0 %vm1120_vm1, %v1094_v14  ;;  %v2645_v14 = vld [vmem:[%s3003_s12 + $0x8] sm:$0xff] }
  0x5b   : > { %2570 = vmatpush.xpose.msk.msra.mxu1 %vm1120_vm1, %v1088_v10  ;;  %v1555_v10 = vld [vmem:[%s3013_s27 + $0x8] sm:$0xff] }
  0x5e   : > { %2571 = vmatmul.msk.f32.vlgmr.msra.gmra.mxu1 %vm1120_vm1, %v1150_v15 }
  0x69   : > { %2566 = vmatmul.msk.bf16.gmra.mxu0 %vm1120_vm1, %v1095_v16 }
  0xd6   : > { %v1136_v18 = vpop.f32.mrf.mxu0 }
  0xd7   : > { %v1211_v17 = vpop.f32.mrf.mxu2  ;;  %v1146_v19 = vpack.c.bf16 %v1136_v18, %v1136_v18 }
  0xd8   : > { %1279 = vperm.xlu1 %2736, %v1211_v17   ;;  %1216 = vperm.xlu0 %2734, %v1211_v17  }
  0xd9   : > { %v1239_v23 = vunpack.c.l.b16 %v1146_v19  ;;  %v2644_v19 = vld [vmem:[%s3003_s12] sm:$0xff] }
  0xdb   : > { %v3185_v34 = vpop.f32.mrf.mxu1 }
  0xdc   : > { %v1282_v35 = vperm.slane %v3185_v34, 1  ;;  %v1219_v36 = vperm.slane %v3185_v34, 0  ;;  %v1396_v50 = vperm.slane %v3185_v34, 3 }
  0xde   : > { %v1138_v20 = vpop.f32.mrf.mxu0 }
  0xdf   : > { %v1147_v22 = vpack.c.bf16 %v1138_v20, %v1138_v20 }
  0xe0   : > { %2735 = vset.pattern.permute.xlu0 %v2917_v21  ;;  %2738 = vset.pattern.permute.xlu1 %v2919_v33 }
  0xe1   : > { %1393 = vperm.xlu0 %2735, %v1211_v17   ;;  %v1240_v24 = vunpack.c.l.b16 %v1147_v22  ;;  %v1485_v22 = vld [vmem:[%s3502_s8 + $0x8] sm:$0xff] }
  0xe3   : > { %v3174_v25 = vpack.c.b16 %v1240_v24, %v1239_v23  ;;  %v1484_v23 = vld [vmem:[%s3502_s8] sm:$0xff] }
  0xe4   : > { %v1488_v24 = vpack.c.bf16 %v1485_v22, %v1484_v23 }
  0xe6   : > { %v1141_v26 = vpop.f32.mrf.mxu0 }
  0xe7   : > { %v1148_v27 = vpack.c.bf16 %v1141_v26, %v1141_v26  ;;  %v1524_v26 = vld [vmem:[%s3008_s20] sm:$0xf] }
  0xe9   : > { %1412 = vrot.lane.b32.xlu0 %v3174_v25, %s3475_s17  ;;  %v1241_v29 = vunpack.c.l.b16 %v1148_v27 }
  0xea   : > { %2740 = vset.pattern.permute.xlu0 %v2916_v5 }
  0xee   : > { %v1143_v28 = vpop.f32.mrf.mxu0 }
  0xef   : > { %v1149_v30 = vpack.c.bf16 %v1143_v28, %v1143_v28 }
  0xf1   : > { %v1242_v31 = vunpack.c.l.b16 %v1149_v30 }
  0xf3   : > { %v3179_v32 = vpack.c.b16 %v1242_v31, %v1241_v29 }
  0xf5   : > { %1256 = vmatpush.bf16.msra.mxu3 %v3179_v32  ;;  %1414 = vrot.lane.b32.xlu2 %v3179_v32, %s3475_s17  ;;  %s3510_s17 = sld [smem:[#allocation18_spill]] }
  0xf9   : > { %1257 = vmatpush.bf16.msra.mxu3 %v3174_v25 }
 0x14a   : > { %v1280_v37 = vpop.permute.xlu1 %1279  ;;  %v1217_v38 = vpop.permute.xlu0 %1216 }
 0x14b   : > { %v1283_v39 = vadd.f32 %v1282_v35, %v1280_v37  ;;  %v1220_v40 = vadd.f32 %v1219_v36, %v1217_v38 }
 0x14d   : > { %vm1284_vm2 = vcmp.ge.f32.partialorder %v1283_v39, 0.0  ;;  %v1285_v42 = vmul.f32 0.2, %v1283_v39  ;;  %vm1221_vm3 = vcmp.ge.f32.partialorder %v1220_v40, 0.0  ;;  %v1222_v43 = vmul.f32 0.2, %v1220_v40 }
 0x14f   : > { %v1286_v44 = vsel %vm1284_vm2, %v1283_v39, %v1285_v42  ;;  %v1223_v45 = vsel %vm1221_vm3, %v1220_v40, %v1222_v43  ;;  %v1415_v57 = vpop.permute.xlu2 %1414  ;;  %vm1943_vm3 = vcmask 1041408  }
 0x150   : > { %v1287_v46 = vadd.f32 %v1286_v44, %v3191_v41  ;;  %v1224_v47 = vadd.f32 %v1223_v45, %v3191_v41  ;;  %1427 = vmatpush.bf16.msrb.mxu3 %v1415_v57 }
 0x152   : > { %v1288_v48 = vsel %vm1190_vm0, %v1287_v46, -inf  ;;  %v1225_v49 = vsel %vm1190_vm0, %v1224_v47, -inf }
 0x153   : > { %1289 = vmax.xlane.f32.xlu0 %v1288_v48  ;;  %1226 = vmax.xlane.f32.xlu1 %v1225_v49  ;;  %v1394_v51 = vpop.permute.xlu0 %1393 }
 0x154   : > { %v1397_v52 = vadd.f32 %v1396_v50, %v1394_v51 }
 0x156   : > { %vm1398_vm4 = vcmp.ge.f32.partialorder %v1397_v52, 0.0  ;;  %v1399_v53 = vmul.f32 0.2, %v1397_v52 }
 0x158   : > { %v1400_v54 = vsel %vm1398_vm4, %v1397_v52, %v1399_v53 }
 0x159   : > { %v1401_v55 = vadd.f32 %v1400_v54, %v3191_v41  ;;  %v3265_v54 = vld [vmem:[%s1069_s10] sm:$0xff]  ;;  %s3508_s10 = sld [smem:[#allocation15_spill]] }
 0x15b   : > { %v1402_v56 = vsel %vm1190_vm0, %v1401_v55, -inf  ;;  %v1413_v58 = vpop.permute.xlu0 %1412 }
 0x15c   : > { %1403 = vmax.xlane.f32.xlu2 %v1402_v56  ;;  %1428 = vmatpush.bf16.msrb.mxu3 %v1413_v58 }
 0x16c   : > { %1336 = vperm.xlu1 %2738, %v1211_v17  }
 0x174   : > { %1300 = vrot.lane.b32.xlu2 %v3179_v32, %s3474_s11 }
 0x17c   : > { %1298 = vrot.lane.b32.xlu2 %v3174_v25, %s3474_s11 }
 0x1c6   : > { %v1227_v59 = vpop.xlane.xlu1 %1226  ;;  %v1290_v62 = vpop.xlane.xlu0 %1289 }
 0x1c7   : > { %v1228_v60 = vsub.f32 %v1224_v47, %v1227_v59  ;;  %v1291_v0 = vsub.f32 %v1287_v46, %v1290_v62 }
 0x1c9   : > { %v1229_v61 = vmul.f32 1.442695, %v1228_v60  ;;  %v1292_v7 = vmul.f32 1.442695, %v1291_v0 }
 0x1cb   : > { %2756 = vpow2.f32 %v1229_v61 }
 0x1cc   : > { %2758 = vpow2.f32 %v1292_v7 }
 0x1cf   : > { %v1404_v63 = vpop.xlane.xlu2 %1403 }
 0x1d0   : > { %v1405_v2 = vsub.f32 %v1401_v55, %v1404_v63 }
 0x1d1   : > { %v3204_v1 = vpop.eup %2756 }
 0x1d2   : > { %v1234_v3 = vpack.c.bf16 %v3204_v1, %v3204_v1  ;;  %v1406_v9 = vmul.f32 1.442695, %v1405_v2  ;;  %v3214_v15 = vpop.eup %2758 }
 0x1d3   : > { %v1297_v18 = vpack.c.bf16 %v3214_v15, %v3214_v15 }
 0x1d4   : > { %2573 = vmatmul.msk.bf16.vlgmr.msra.gmra.mxu3 %vm1190_vm0, %v1234_v3  ;;  %2760 = vpow2.f32 %v1406_v9 }
 0x1d5   : > { %1570 = vmatpush.msra.mxu3 %v1557_v6 }
 0x1d7   : > { %v1301_v11 = vpop.permute.xlu2 %1300  ;;  %1571 = vmatpush.msra.mxu3 %v1556_v8 }
 0x1d8   : > { %1313 = vmatpush.bf16.msrb.mxu2 %v1301_v11  ;;  %v1897_v11 = vld [vmem:[%s3033_s21 + $0x18] sm:$0xff] }
 0x1d9   : > { %1572 = vmatpush.msra.mxu3 %v1555_v10 }
 0x1da   : > { %v3216_v16 = vpop.eup %2760 }
 0x1db   : > { %1573 = vmatpush.msra.mxu3 %v1554_v13  ;;  %v1411_v20 = vpack.c.bf16 %v3216_v16, %v3216_v16  ;;  %v1896_v13 = vld [vmem:[%s3033_s21 + $0x10] sm:$0xff] }
 0x1de   : > { %v1337_v44 = vpop.permute.xlu1 %1336 }
 0x1df   : > { %v1299_v17 = vpop.permute.xlu2 %1298 }
 0x1e0   : > { %1314 = vmatpush.bf16.msrb.mxu2 %v1299_v17  ;;  %v1894_v17 = vld [vmem:[%s3033_s21] sm:$0xff] }
 0x1e3   : > { %2574 = vmatmul.msk.bf16.vlgmr.msrb.gmra.mxu2 %vm1190_vm0, %v1297_v18 }
 0x1e4   : > { %1514 = vmatpush.bf16.msra.mxu2 %v2645_v14  ;;  %2576 = vmatmul.msk.bf16.vlgmr.msrb.gmra.mxu3 %vm1190_vm0, %v1411_v20  ;;  %v1895_v14 = vld [vmem:[%s3033_s21 + $0x8] sm:$0xff] }
 0x1e8   : > { %1515 = vmatpush.bf16.msra.mxu2 %v2644_v19 }
 0x1ec   : > { %2587 = vmatpush.xpose.msk.msrb.mxu2 %vm1190_vm0, %v1485_v22 }
 0x1f0   : > { %2588 = vmatpush.xpose.msk.msrb.mxu2 %vm1190_vm0, %v1484_v23 }
 0x1f3   : > { %2586 = vmatmul.msk.bf16.vlgmr.msra.gmra.mxu2 %vm1190_vm0, %v1488_v24 }
 0x1f4   : > { %2590 = vmatmul.msk.f32.vlgmr.msra.gmra.mxu3 %vm1190_vm0, %v3161_v12 }
 0x203   : > { %2589 = vmatmul.msk.f32.vlgmr.msrb.gmra.mxu2 %vm1190_vm0, %v1524_v26 }
 0x257   : > { %v3234_v27 = vpop.f32.mrf.mxu3 }
 0x25f   : > { %v1261_v28 = vpop.f32.mrf.mxu3 }
 0x266   : > { %v3236_v29 = vpop.f32.mrf.mxu2 }
 0x267   : > { %v3238_v30 = vpop.f32.mrf.mxu3 }
 0x26e   : > { %v1318_v31 = vpop.f32.mrf.mxu2 }
 0x26f   : > { %v1432_v33 = vpop.f32.mrf.mxu3 }
 0x276   : > { %v1517_v35 = vpop.f32.mrf.mxu2 }
 0x277   : > { %v3240_v36 = vpop.f32.mrf.mxu3  ;;  %v1522_v37 = vpack.c.bf16 %v1517_v35, %v1517_v35 }
 0x278   : > { %1580 = vperm.xlu0 %2740, %v3240_v36   ;;  %1691 = vperm.xlu2 %2737, %v3240_v36  }
 0x279   : > { %v1601_v39 = vunpack.c.l.b16 %v1522_v37 }
 0x27e   : > { %v1519_v38 = vpop.f32.mrf.mxu2 }
 0x27f   : > { %v1523_v40 = vpack.c.bf16 %v1519_v38, %v1519_v38 }
 0x280   : > { %1355 = vrot.lane.b32.xlu0 %v3174_v25, %s2921_s6  ;;  %2739 = vset.pattern.permute.xlu2 %v2915_v4  ;;  %v1339_v25 = vperm.slane %v3185_v34, 2 }
 0x281   : > { %v1602_v42 = vunpack.c.l.b16 %v1523_v40  ;;  %1637 = vperm.xlu2 %2739, %v3240_v36   ;;  %2742 = vset.pattern.permute.xlu0 %v2917_v21 }
 0x282   : > { %v1340_v45 = vadd.f32 %v1339_v25, %v1337_v44  ;;  %v1830_v25 = vld [vmem:[%s3508_s10] sm:$0xf] }
 0x283   : > { %v3249_v43 = vpack.c.b16 %v1602_v42, %v1601_v39 }
 0x284   : > { %v1342_v46 = vmul.f32 0.2, %v1340_v45  ;;  %vm1341_vm5 = vcmp.ge.f32.partialorder %v1340_v45, 0.0 }
 0x285   : > { %1710 = vrot.lane.b32.xlu1 %v3249_v43, %s2921_s6  ;;  %1615 = vmatpush.bf16.msrb.mxu0 %v3249_v43 }
 0x286   : > { %v1343_v47 = vsel %vm1341_vm5, %v1340_v45, %v1342_v46  ;;  %v3260_v50 = vpop.f32.mrf.mxu2 }
 0x287   : > { %v1344_v48 = vadd.f32 %v1343_v47, %v3191_v41  ;;  %v1694_v51 = vperm.slane %v3260_v50, 2  ;;  %v1640_v56 = vperm.slane %v3260_v50, 1  ;;  %v1583_v3 = vperm.slane %v3260_v50, 0 }
 0x289   : > { %2744 = vset.pattern.permute.xlu2 %v2916_v5  ;;  %v1345_v49 = vsel %vm1190_vm0, %v1344_v48, -inf }
 0x2af   : > { %1346 = vmax.xlane.f32.xlu1 %v1345_v49 }
 0x2c8   : > { %1656 = vrot.lane.b32.xlu1 %v3249_v43, %s3474_s11  ;;  %s3509_s11 = sld [smem:[#allocation19_spill]] }
 0x2ce   : > { %v1867_v45 = vld [vmem:[%s3509_s11] sm:$0xf]  ;;  %s3511_s11 = sld [smem:[#allocation9_spill]] }
 0x2d2   : > { %v1692_v52 = vpop.permute.xlu2 %1691 }
 0x2d3   : > { %v1695_v53 = vadd.f32 %v1694_v51, %v1692_v52 }
 0x2d4   : > { %s1073_s10 = scalar_lea.vmem %s3511_s11, %s3150_s23  ;;  %s3512_s11 = smov 104  }
 0x2d5   : > { %vm1696_vm6 = vcmp.ge.f32.partialorder %v1695_v53, 0.0  ;;  %v1697_v34 = vmul.f32 0.2, %v1695_v53 }
 0x2d7   : > { %v1698_v55 = vsel %vm1696_vm6, %v1695_v53, %v1697_v34 }
 0x2d8   : > { %v1699_v41 = vadd.f32 %v1698_v55, %v3265_v54  ;;  %v2646_v55 = vld [vmem:[%s3510_s17] sm:$0xff] }
 0x2da   : > { %v1700_v57 = vsel %vm1463_vm7, %v1699_v41, -inf }
 0x2db   : > { %v1638_v58 = vpop.permute.xlu2 %1637  ;;  %1701 = vmax.xlane.f32.xlu2 %v1700_v57 }
 0x2dc   : > { %v1641_v59 = vadd.f32 %v1640_v56, %v1638_v58 }
 0x2de   : > { %vm1642_vm8 = vcmp.ge.f32.partialorder %v1641_v59, 0.0  ;;  %v1643_v60 = vmul.f32 0.2, %v1641_v59 }
 0x2e0   : > { %v1644_v61 = vsel %vm1642_vm8, %v1641_v59, %v1643_v60 }
 0x2e1   : > { %v1645_v62 = vadd.f32 %v1644_v61, %v3265_v54 }
 0x2e3   : > { %v1646_v63 = vsel %vm1463_vm7, %v1645_v62, -inf }
 0x2e4   : > { %1647 = vmax.xlane.f32.xlu0 %v1646_v63 }
 0x2ea   : > { %v1581_v2 = vpop.permute.xlu0 %1580 }
 0x2eb   : > { %v1584_v6 = vadd.f32 %v1583_v3, %v1581_v2 }
 0x2ed   : > { %v1586_v7 = vmul.f32 0.2, %v1584_v6  ;;  %vm1585_vm9 = vcmp.ge.f32.partialorder %v1584_v6, 0.0 }
 0x2ef   : > { %v1587_v8 = vsel %vm1585_vm9, %v1584_v6, %v1586_v7 }
 0x2f0   : > { %v1588_v9 = vadd.f32 %v1587_v8, %v3265_v54 }
 0x2f2   : > { %v1589_v10 = vsel %vm1463_vm7, %v1588_v9, -inf  ;;  %v1356_v23 = vpop.permute.xlu0 %1355 }
 0x2f3   : > { %1357 = vrot.lane.b32.xlu2 %v3179_v32, %s2921_s6 }
 0x2f7   : > { %v1711_v0 = vpop.permute.xlu1 %1710 }
 0x2f8   : > { %1723 = vmatpush.bf16.msra.mxu2 %v1711_v0 }
 0x2fc   : > { %1910 = vmatpush.msrb.mxu2 %v1897_v11 }
 0x2fe   : > { %1911 = vmatpush.msrb.mxu2 %v1896_v13 }
 0x300   : > { %1912 = vmatpush.msrb.mxu2 %v1895_v14 }
 0x302   : > { %1913 = vmatpush.msrb.mxu2 %v1894_v17 }
 0x31c   : > { %1590 = vmax.xlane.f32.xlu2 %v1589_v10 }
 0x322   : > { %v1347_v32 = vpop.xlane.xlu1 %1346 }
 0x323   : > { %v1348_v18 = vsub.f32 %v1344_v48, %v1347_v32 }
 0x325   : > { %v1349_v19 = vmul.f32 1.442695, %v1348_v18 }
 0x327   : > { %2762 = vpow2.f32 %v1349_v19 }
 0x32d   : > { %v3281_v28 = vpop.eup %2762 }
 0x32e   : > { %v1354_v39 = vpack.c.bf16 %v3281_v28, %v3281_v28 }
 0x33a   : > { %v1657_v37 = vpop.permute.xlu1 %1656 }
 0x34e   : > { %v1702_v20 = vpop.xlane.xlu2 %1701 }
 0x34f   : > { %v1703_v22 = vsub.f32 %v1699_v41, %v1702_v20  ;;  %v1833_v41 = vpack.c.bf16 %v1830_v25, %v1830_v25 }
 0x351   : > { %v1704_v24 = vmul.f32 1.442695, %v1703_v22 }
 0x353   : > { %2764 = vpow2.f32 %v1704_v24 }
 0x356   : > { %v1358_v26 = vpop.permute.xlu2 %1357 }
 0x357   : > { %1370 = vmatpush.bf16.msrb.mxu1 %v1358_v26  ;;  %v1648_v31 = vpop.xlane.xlu0 %1647 }
 0x358   : > { %v1649_v38 = vsub.f32 %v1645_v62, %v1648_v31 }
 0x359   : > { %v3283_v33 = vpop.eup %2764 }
 0x35a   : > { %v1709_v35 = vpack.c.bf16 %v3283_v33, %v3283_v33  ;;  %v1650_v40 = vmul.f32 1.442695, %v1649_v38  ;;  %v1748_v38 = vperm.slane %v3260_v50, 3 }
 0x35b   : > { %1371 = vmatpush.bf16.msrb.mxu1 %v1356_v23 }
 0x35c   : > { %2593 = vmatmul.msk.bf16.vlgmr.msra.gmra.mxu2 %vm1463_vm7, %v1709_v35  ;;  %2766 = vpow2.f32 %v1650_v40 }
 0x35e   : > { %2575 = vmatmul.msk.bf16.vlgmr.msrb.gmra.mxu1 %vm1190_vm0, %v1354_v39 }
 0x35f   : > { %1669 = vmatpush.bf16.msra.mxu1 %v1657_v37 }
 0x362   : > { %v3291_v42 = vpop.eup %2766 }
 0x363   : > { %v1655_v44 = vpack.c.bf16 %v3291_v42, %v3291_v42  ;;  %2601 = vmatpush.xpose.msk.msrb.mxu1 %vm1465_vm10, %v1830_v25 }
 0x36c   : > { %2603 = vmatmul.msk.f32.vlgmr.msrb.gmra.mxu2 %vm1190_vm0, %v3161_v12  ;;  %v1836_v12 = vld [vmem:[%s3510_s17 + $0x8] sm:$0xf] }
 0x36d   : > { %v1842_v52 = vunpack.c.l.b16 %v1836_v12 }
 0x36e   : > { %2592 = vmatmul.msk.bf16.vlgmr.msra.gmra.mxu1 %vm1463_vm7, %v1655_v44 }
 0x36f   : > { %v1844_v53 = vpack.c.b16 %v1842_v52, %v1842_v52 }
 0x371   : > { %v1851_v34 = vsel %vm1849_vm11, %v1844_v53, 0 }
 0x372   : > { %1859 = vmatpush.bf16.msra.mxu0 %v1851_v34 }
 0x376   : > { %1860 = vmatpush.bf16.msra.mxu0 %v2646_v55 }
 0x37e   : > { %2602 = vmatmul.msk.f32.vlgmr.msrb.gmra.mxu1 %vm1465_vm10, %v1867_v45 }
 0x38f   : > { %v1591_v46 = vpop.xlane.xlu2 %1590 }
 0x390   : > { %v1592_v47 = vsub.f32 %v1588_v9, %v1591_v46 }
 0x392   : > { %v1593_v48 = vmul.f32 1.442695, %v1592_v47 }
 0x394   : > { %2768 = vpow2.f32 %v1593_v48 }
 0x39a   : > { %v3302_v49 = vpop.eup %2768 }
 0x39b   : > { %v1598_v51 = vpack.c.bf16 %v3302_v49, %v3302_v49 }
 0x39d   : > { %2591 = vmatmul.msk.bf16.vlgmr.msrb.gmra.mxu0 %vm1463_vm7, %v1598_v51 }
 0x3ad   : > { %2600 = vmatmul.msk.bf16.vlgmr.msra.gmra.mxu0 %vm1465_vm10, %v1833_v41  ;;  %v1408_v41 = vsel %vm1190_vm0, %v3216_v16, 0.0 }
 0x3db   : > { %v3309_v56 = vpop.f32.mrf.mxu1 }
 0x3df   : > { %v3312_v57 = vpop.f32.mrf.mxu2 }
 0x3e3   : > { %v1375_v58 = vpop.f32.mrf.mxu1 }
 0x3e4   : > { %v1294_v58 = vsel %vm1190_vm0, %v3214_v15, 0.0 }
 0x3e7   : > { %v1727_v59 = vpop.f32.mrf.mxu2 }
 0x3eb   : > { %v3314_v60 = vpop.f32.mrf.mxu1 }
 0x3ef   : > { %v1915_v61 = vpop.f32.mrf.mxu2 }
 0x3f0   : > { %2091 = vperm.xlu0 %2742, %v1915_v61   ;;  %2035 = vperm.xlu1 %2738, %v1915_v61  }
 0x3f1   : > { %1920 = vperm.xlu2 %2744, %v1915_v61  }
 0x3f3   : > { %v1673_v62 = vpop.f32.mrf.mxu1 }
 0x3f8   : > { %2741 = vset.pattern.permute.xlu1 %v2915_v4  ;;  %2746 = vset.pattern.permute.xlu0 %v2916_v5 }
 0x3f9   : > { %1976 = vperm.xlu1 %2741, %v1915_v61  }
 0x3fb   : > { %v1891_v3 = vpop.f32.mrf.mxu1 }
 0x3fc   : > { %v2038_v6 = vperm.slane %v1891_v3, 2  ;;  %v2094_v7 = vperm.slane %v1891_v3, 3  ;;  %v1979_v18 = vperm.slane %v1891_v3, 1  ;;  %v1923_v31 = vperm.slane %v1891_v3, 0 }
 0x401   : > { %2743 = vset.pattern.permute.xlu1 %v2917_v21 }
 0x402   : > { %1745 = vperm.xlu1 %2743, %v3240_v36   ;;  %v1831_v36 = vld [vmem:[%s1073_s10] sm:$0xff]  ;;  %s3513_s10 = smov 120  }
 0x40a   : > { %2745 = vset.pattern.permute.xlu1 %v2916_v5 }
 0x41a   : > { %v3321_v63 = vpop.f32.mrf.mxu0 }
 0x422   : > { %v1619_v0 = vpop.f32.mrf.mxu0 }
 0x42a   : > { %v1862_v2 = vpop.f32.mrf.mxu0 }
 0x42b   : > { %v3329_v46 = vpack.c.bf16 %v1862_v2, %v1862_v2 }
 0x42d   : > { %v1996_v12 = vunpack.c.l.b16 %v3329_v46 }
 0x42f   : > { %v1997_v53 = vpack.c.b16 %v1996_v12, %v1996_v12 }
 0x432   : > { %v1864_v8 = vpop.f32.mrf.mxu0 }
 0x44b   : > { %v1921_v37 = vpop.permute.xlu2 %1920 }
 0x44c   : > { %v1924_v44 = vadd.f32 %v1923_v31, %v1921_v37 }
 0x44e   : > { %v1926_v47 = vmul.f32 0.2, %v1924_v44  ;;  %vm1925_vm2 = vcmp.ge.f32.partialorder %v1924_v44, 0.0 }
 0x450   : > { %v1927_v50 = vsel %vm1925_vm2, %v1924_v44, %v1926_v47 }
 0x451   : > { %v3334_v34 = vadd.f32 %v1927_v50, %v1831_v36 }
 0x453   : > { %v1930_v55 = vsel %vm1929_vm14, %v3334_v34, -inf }
 0x462   : > { %v2036_v4 = vpop.permute.xlu1 %2035  ;;  %v2092_v9 = vpop.permute.xlu0 %2091 }
 0x463   : > { %v2039_v10 = vadd.f32 %v2038_v6, %v2036_v4  ;;  %v2095_v11 = vadd.f32 %v2094_v7, %v2092_v9 }
 0x465   : > { %vm2040_vm12 = vcmp.ge.f32.partialorder %v2039_v10, 0.0  ;;  %v2041_v13 = vmul.f32 0.2, %v2039_v10  ;;  %vm2096_vm13 = vcmp.ge.f32.partialorder %v2095_v11, 0.0  ;;  %v2097_v21 = vmul.f32 0.2, %v2095_v11 }
 0x467   : > { %v2042_v14 = vsel %vm2040_vm12, %v2039_v10, %v2041_v13  ;;  %v2098_v5 = vsel %vm2096_vm13, %v2095_v11, %v2097_v21 }
 0x468   : > { %v2043_v32 = vadd.f32 %v2042_v14, %v1831_v36  ;;  %v2099_v17 = vadd.f32 %v2098_v5, %v1831_v36 }
 0x46a   : > { %v2044_v19 = vsel %vm1929_vm14, %v2043_v32, -inf  ;;  %v2100_v20 = vsel %vm1929_vm14, %v2099_v17, -inf }
 0x46b   : > { %v1977_v22 = vpop.permute.xlu1 %1976  ;;  %2045 = vmax.xlane.f32.xlu1 %v2044_v19  ;;  %2101 = vmax.xlane.f32.xlu0 %v2100_v20 }
 0x46c   : > { %v1980_v23 = vadd.f32 %v1979_v18, %v1977_v22  ;;  %v1231_v18 = vsel %vm1190_vm0, %v3204_v1, 0.0  ;;  %v1945_v1 = vsel %vm1943_vm3, %v3329_v46, 0 }
 0x46e   : > { %vm1981_vm15 = vcmp.ge.f32.partialorder %v1980_v23, 0.0  ;;  %v1982_v24 = vmul.f32 0.2, %v1980_v23 }
 0x470   : > { %v1983_v26 = vsel %vm1981_vm15, %v1980_v23, %v1982_v24 }
 0x471   : > { %v1984_v35 = vadd.f32 %v1983_v26, %v1831_v36 }
 0x473   : > { %v1985_v39 = vsel %vm1929_vm14, %v1984_v35, -inf }
 0x474   : > { %v1746_v40 = vpop.permute.xlu1 %1745  ;;  %1986 = vmax.xlane.f32.xlu2 %v1985_v39 }
 0x475   : > { %v1749_v25 = vadd.f32 %v1748_v38, %v1746_v40 }
 0x477   : > { %vm1750_vm1 = vcmp.ge.f32.partialorder %v1749_v25, 0.0  ;;  %v1751_v45 = vmul.f32 0.2, %v1749_v25 }
 0x479   : > { %v1752_v48 = vsel %vm1750_vm1, %v1749_v25, %v1751_v45 }
 0x47a   : > { %v1753_v51 = vadd.f32 %v1752_v48, %v3265_v54  ;;  %v1351_v54 = vsel %vm1190_vm0, %v3281_v28, 0.0 }
 0x47c   : > { %v1754_v52 = vsel %vm1463_vm7, %v1753_v51, -inf }
 0x47d   : > { %1755 = vmax.xlane.f32.xlu0 %v1754_v52 }
 0x484   : > { %2054 = vrot.lane.b32.xlu1 %v1997_v53, %s2921_s6  ;;  %s3477_s6 = smov 16  }
 0x485   : > { %1931 = vmax.xlane.f32.xlu0 %v1930_v55 }
 0x48c   : > { %2110 = vrot.lane.b32.xlu1 %v1997_v53, %s3512_s11  ;;  %1998 = vrot.lane.b32.xlu2 %v1997_v53, %s3513_s10  ;;  %s3515_s10 = sld [smem:[#allocation10_spill]] }
 0x48d   : > { %1352 = vadd.xlane.f32.xlu0 %v1351_v54 }
 0x492   : > { %s1077_s8 = scalar_lea.vmem %s3515_s10, %s3150_s23  ;;  %s3519_s10 = sld [smem:[#allocation20_spill]] }
 0x494   : > { %1764 = vrot.lane.b32.xlu1 %v3249_v43, %s3512_s11  ;;  %s3514_s11 = sld [smem:[#allocation12_spill]] }
 0x495   : > { %1409 = vadd.xlane.f32.xlu0 %v1408_v41 }
 0x49a   : > { %s1085_s5 = scalar_lea.vmem %s3514_s11, %s3150_s23  ;;  %s3518_s11 = sld [smem:[#allocation21_spill]] }
 0x4be   : > { %1295 = vadd.xlane.f32.xlu1 %v1294_v58 }
 0x4de   : > { %v2046_v59 = vpop.xlane.xlu1 %2045  ;;  %v2102_v61 = vpop.xlane.xlu0 %2101 }
 0x4df   : > { %v2047_v62 = vsub.f32 %v2043_v32, %v2046_v59  ;;  %v2103_v2 = vsub.f32 %v2099_v17, %v2102_v61 }
 0x4e1   : > { %v2048_v0 = vmul.f32 1.442695, %v2047_v62  ;;  %v2104_v3 = vmul.f32 1.442695, %v2103_v2 }
 0x4e3   : > { %2770 = vpow2.f32 %v2048_v0 }
 0x4e4   : > { %2772 = vpow2.f32 %v2104_v3 }
 0x4e7   : > { %v1987_v28 = vpop.xlane.xlu2 %1986 }
 0x4e8   : > { %v1988_v6 = vsub.f32 %v1984_v35, %v1987_v28 }
 0x4e9   : > { %v2771_v7 = vpop.eup %2770 }
 0x4ea   : > { %v1989_v43 = vmul.f32 1.442695, %v1988_v6  ;;  %v2050_v8 = vsel %vm1929_vm14, %v2771_v7, 0.0  ;;  %v2773_v16 = vpop.eup %2772  ;;  %v2053_v17 = vpack.c.bf16 %v2771_v7, %v2771_v7 }
 0x4eb   : > { %2051 = vadd.xlane.f32.xlu0 %v2050_v8  ;;  %v2106_v11 = vsel %vm1929_vm14, %v2773_v16, 0.0  ;;  %v2109_v24 = vpack.c.bf16 %v2773_v16, %v2773_v16 }
 0x4ec   : > { %2774 = vpow2.f32 %v1989_v43 }
 0x4ef   : > { %v1999_v15 = vpop.permute.xlu2 %1998 }
 0x4f0   : > { %v2004_v4 = vsel %vm1943_vm3, %v1999_v15, 0  ;;  %v1756_v9 = vpop.xlane.xlu0 %1755 }
 0x4f1   : > { %2013 = vmatpush.bf16.msra.mxu1 %v2004_v4  ;;  %v1757_v14 = vsub.f32 %v1753_v51, %v1756_v9 }
 0x4f2   : > { %v2775_v10 = vpop.eup %2774 }
 0x4f3   : > { %v1994_v13 = vpack.c.bf16 %v2775_v10, %v2775_v10  ;;  %2107 = vadd.xlane.f32.xlu0 %v2106_v11  ;;  %v1991_v21 = vsel %vm1929_vm14, %v2775_v10, 0.0  ;;  %v1758_v19 = vmul.f32 1.442695, %v1757_v14  ;;  %v1093_v14 = vld [vmem:[%s1077_s8] sm:$0xff]  ;;  %s3517_s8 = sld [smem:[#allocation16_spill]] }
 0x4f4   : > { %1992 = vadd.xlane.f32.xlu2 %v1991_v21 }
 0x4f5   : > { %2605 = vmatmul.msk.bf16.vlgmr.msra.gmra.mxu1 %vm1929_vm14, %v1994_v13  ;;  %2776 = vpow2.f32 %v1758_v19 }
 0x4f6   : > { %v2055_v36 = vpop.permute.xlu1 %2054 }
 0x4f7   : > { %v2060_v5 = vsel %vm1943_vm3, %v2055_v36, 0  ;;  %v1832_v36 = vld [vmem:[%s1085_s5] sm:$0xff]  ;;  %s3516_s5 = smov 16  }
 0x4f8   : > { %2069 = vmatpush.bf16.msra.mxu2 %v2060_v5  ;;  %v1932_v32 = vpop.xlane.xlu0 %1931 }
 0x4f9   : > { %v1933_v37 = vsub.f32 %v3334_v34, %v1932_v32 }
 0x4fb   : > { %2606 = vmatmul.msk.bf16.vlgmr.msra.gmra.mxu2 %vm1929_vm14, %v2053_v17  ;;  %1232 = vadd.xlane.f32.xlu0 %v1231_v18  ;;  %v3360_v26 = vpop.eup %2776  ;;  %v1934_v44 = vmul.f32 1.442695, %v1933_v37 }
 0x4fc   : > { %v1763_v38 = vpack.c.bf16 %v3360_v26, %v3360_v26 }
 0x4fe   : > { %v2111_v20 = vpop.permute.xlu1 %2110 }
 0x4ff   : > { %v2116_v22 = vsel %vm1943_vm3, %v2111_v20, 0 }
 0x500   : > { %2125 = vmatpush.bf16.msrb.mxu0 %v2116_v22  ;;  %v1353_v23 = vpop.xlane.xlu0 %1352 }
 0x501   : > { %2778 = vrcp.f32 %v1353_v23  ;;  %v1388_v25 = vand.u32 2147483648, %v1353_v23  ;;  %v1386_v47 = vand.u32 2147483647, %v1353_v23  ;;  %vm1382_vm5 = vweird.f32 %v1353_v23 }
 0x502   : > { %2780 = vpow2.f32 %v1934_v44 }
 0x503   : > { %2607 = vmatmul.msk.bf16.vlgmr.msrb.gmra.mxu0 %vm1929_vm14, %v2109_v24  ;;  %v1389_v46 = vor.u32 1.1754944e-38, %v1388_v25  ;;  %vm1387_vm8 = vcmp.eq.f32.partialorder %v1386_v47, 8.507059e+37 }
 0x506   : > { %v1765_v31 = vpop.permute.xlu1 %1764 }
 0x507   : > { %v2779_v35 = vpop.eup %2778  ;;  %1777 = vmatpush.bf16.msrb.mxu3 %v1765_v31 }
 0x508   : > { %v1378_v39 = vmul.f32 %v2779_v35, %v1353_v23  ;;  %vm1383_vm4 = vweird.f32 %v2779_v35  ;;  %v2781_v50 = vpop.eup %2780  ;;  %v1410_v34 = vpop.xlane.xlu0 %1409 }
 0x509   : > { %vm1384_vm6 = vmor %vm1382_vm5, %vm1383_vm4  ;;  %v1939_v53 = vpack.c.bf16 %v2781_v50, %v2781_v50  ;;  %2782 = vrcp.f32 %v1410_v34  ;;  %v1445_v16 = vand.u32 2147483648, %v1410_v34  ;;  %v1443_v9 = vand.u32 2147483647, %v1410_v34 }
 0x50a   : > { %v1379_v40 = vsub.f32 1.0, %v1378_v39  ;;  %2594 = vmatmul.msk.bf16.vlgmr.msrb.gmra.mxu3 %vm1463_vm7, %v1763_v38 }
 0x50b   : > { %1954 = vmatpush.bf16.msra.mxu3 %v1945_v1  ;;  %v1446_v11 = vor.u32 1.1754944e-38, %v1445_v16  ;;  %vm1444_vm2 = vcmp.eq.f32.partialorder %v1443_v9, 8.507059e+37 }
 0x50c   : > { %v1380_v45 = vmul.f32 %v2779_v35, %v1379_v40 }
 0x50e   : > { %v1381_v48 = vadd.f32 %v2779_v35, %v1380_v45 }
 0x50f   : > { %v2783_v54 = vpop.eup %2782 }
 0x510   : > { %v1385_v51 = vsel %vm1384_vm6, %v2779_v35, %v1381_v48  ;;  %v1435_v41 = vmul.f32 %v2783_v54, %v1410_v34  ;;  %vm1440_vm15 = vweird.f32 %v2783_v54 }
 0x511   : > { %v1390_v12 = vsel %vm1387_vm8, %v1389_v46, %v1385_v51 }
 0x512   : > { %v1391_v52 = vmul.f32 %v1390_v12, %v3309_v56  ;;  %v1436_v59 = vsub.f32 1.0, %v1435_v41  ;;  %v1936_v56 = vsel %vm1929_vm14, %v2781_v50, 0.0  ;;  %v1760_v50 = vsel %vm1463_vm7, %v3360_v26, 0.0 }
 0x514   : > { %1454 = vrot.lane.b32.xlu1 %v1391_v52, %s3477_s6  ;;  %v1437_v2 = vmul.f32 %v2783_v54, %v1436_v59  ;;  %s2923_s6 = smov 8  }
 0x516   : > { %v1438_v8 = vadd.f32 %v2783_v54, %v1437_v2 }
 0x51a   : > { %2604 = vmatmul.msk.bf16.vlgmr.msra.gmra.mxu3 %vm1929_vm14, %v1939_v53  ;;  %vm1439_vm14 = vweird.f32 %v1410_v34 }
 0x51b   : > { %vm1441_vm1 = vmor %vm1439_vm14, %vm1440_vm15 }
 0x51c   : > { %v1442_v10 = vsel %vm1441_vm1, %v2783_v54, %v1438_v8 }
 0x51d   : > { %v1447_v13 = vsel %vm1444_vm2, %v1446_v11, %v1442_v10  ;;  %v1652_v11 = vsel %vm1463_vm7, %v3291_v42, 0.0 }
 0x51e   : > { %v1448_v21 = vmul.f32 %v1447_v13, %v3238_v30 }
 0x531   : > { %v1296_v55 = vpop.xlane.xlu1 %1295 }
 0x532   : > { %2784 = vrcp.f32 %v1296_v55  ;;  %v1331_v0 = vand.u32 2147483648, %v1296_v55  ;;  %v1329_v28 = vand.u32 2147483647, %v1296_v55  ;;  %vm1325_vm11 = vweird.f32 %v1296_v55 }
 0x534   : > { %v1332_v7 = vor.u32 1.1754944e-38, %v1331_v0  ;;  %vm1330_vm13 = vcmp.eq.f32.partialorder %v1329_v28, 8.507059e+37 }
 0x538   : > { %v2785_v58 = vpop.eup %2784 }
 0x539   : > { %v1321_v61 = vmul.f32 %v2785_v58, %v1296_v55  ;;  %vm1326_vm9 = vweird.f32 %v2785_v58 }
 0x53a   : > { %vm1327_vm12 = vmor %vm1325_vm11, %vm1326_vm9 }
 0x53b   : > { %v1322_v62 = vsub.f32 1.0, %v1321_v61 }
 0x53d   : > { %v1323_v3 = vmul.f32 %v2785_v58, %v1322_v62 }
 0x53e   : > { %1937 = vadd.xlane.f32.xlu1 %v1936_v56 }
 0x53f   : > { %v1324_v6 = vadd.f32 %v2785_v58, %v1323_v3 }
 0x541   : > { %v1328_v43 = vsel %vm1327_vm12, %v2785_v58, %v1324_v6  ;;  %v1706_v58 = vsel %vm1463_vm7, %v3283_v33, 0.0  ;;  %v1595_v6 = vsel %vm1463_vm7, %v3302_v49, 0.0 }
 0x542   : > { %v1333_v15 = vsel %vm1330_vm13, %v1332_v7, %v1328_v43 }
 0x543   : > { %v1334_v4 = vmul.f32 %v1333_v15, %v3236_v29 }
 0x545   : > { %1450 = vrot.lane.b32.xlu2 %v1334_v4, %s2923_s6 }
 0x54d   : > { %1458 = vrot.lane.b32.xlu2 %v1448_v21, %s2924_s3 }
 0x555   : > { %2163 = vperm.xlu2 %2744, %v1832_v36  }
 0x557   : > { %1469 = vperm.xlu1 %2745, %v1093_v14  }
 0x55e   : > { %v2052_v29 = vpop.xlane.xlu0 %2051 }
 0x55f   : > { %2786 = vrcp.f32 %v2052_v29  ;;  %v2086_v51 = vand.u32 2147483648, %v2052_v29  ;;  %vm2080_vm9 = vweird.f32 %v2052_v29  ;;  %v2084_v12 = vand.u32 2147483647, %v2052_v29 }
 0x561   : > { %v2087_v55 = vor.u32 1.1754944e-38, %v2086_v51  ;;  %vm2085_vm12 = vcmp.eq.f32.partialorder %v2084_v12, 8.507059e+37 }
 0x565   : > { %v2787_v17 = vpop.eup %2786 }
 0x566   : > { %v2108_v32 = vpop.xlane.xlu0 %2107  ;;  %v2076_v18 = vmul.f32 %v2787_v17, %v2052_v29  ;;  %vm2081_vm8 = vweird.f32 %v2787_v17 }
 0x567   : > { %v1993_v5 = vpop.xlane.xlu2 %1992  ;;  %vm2082_vm11 = vmor %vm2080_vm9, %vm2081_vm8  ;;  %v2142_v62 = vand.u32 2147483648, %v2108_v32  ;;  %vm2136_vm15 = vweird.f32 %v2108_v32  ;;  %v2140_v0 = vand.u32 2147483647, %v2108_v32 }
 0x568   : > { %2788 = vrcp.f32 %v1993_v5  ;;  %v2077_v30 = vsub.f32 1.0, %v2076_v18  ;;  %v2030_v31 = vand.u32 2147483648, %v1993_v5  ;;  %v2028_v1 = vand.u32 2147483647, %v1993_v5 }
 0x569   : > { %2790 = vrcp.f32 %v2108_v32  ;;  %vm2024_vm4 = vweird.f32 %v1993_v5  ;;  %v2143_v56 = vor.u32 1.1754944e-38, %v2142_v62  ;;  %vm2141_vm1 = vcmp.eq.f32.partialorder %v2140_v0, 8.507059e+37 }
 0x56a   : > { %v2078_v39 = vmul.f32 %v2787_v17, %v2077_v30  ;;  %v2031_v40 = vor.u32 1.1754944e-38, %v2030_v31  ;;  %vm2029_vm6 = vcmp.eq.f32.partialorder %v2028_v1, 8.507059e+37  ;;  %v2747_v30 = vld [vmem:[%s3517_s8] ss:$0 sm:$0xff]  ;;  %s3520_s8 = sld [smem:[#allocation22_spill]] }
 0x56c   : > { %v2079_v48 = vadd.f32 %v2787_v17, %v2078_v39  ;;  %v2748_v39 = vld [vmem:[%s3518_s11] ss:$0 sm:$0xff]  ;;  %s2178_s11 = sld [smem:[#allocation2]] }
 0x56e   : > { %v2789_v19 = vpop.eup %2788  ;;  %v2083_v52 = vsel %vm2082_vm11, %v2787_v17, %v2079_v48  ;;  %v1233_v16 = vpop.xlane.xlu0 %1232 }
 0x56f   : > { %v2020_v20 = vmul.f32 %v2789_v19, %v1993_v5  ;;  %v2791_v23 = vpop.eup %2790  ;;  %vm2025_vm3 = vweird.f32 %v2789_v19  ;;  %v2088_v54 = vsel %vm2085_vm12, %v2087_v55, %v2083_v52  ;;  %2792 = vrcp.f32 %v1233_v16 }
 0x570   : > { %v2132_v37 = vmul.f32 %v2791_v23, %v2108_v32  ;;  %vm2026_vm5 = vmor %vm2024_vm4, %vm2025_vm3  ;;  %vm2137_vm13 = vweird.f32 %v2791_v23  ;;  %v1274_v36 = vand.u32 2147483648, %v1233_v16  ;;  %vm1268_vm3 = vweird.f32 %v1233_v16 }
 0x571   : > { %v2021_v22 = vsub.f32 1.0, %v2020_v20  ;;  %vm2138_vm14 = vmor %vm2136_vm15, %vm2137_vm13  ;;  %v1272_v14 = vand.u32 2147483647, %v1233_v16 }
 0x572   : > { %v2015_v24 = vpop.f32.mrf.mxu1  ;;  %v2133_v45 = vsub.f32 1.0, %v2132_v37  ;;  %v1275_v32 = vor.u32 1.1754944e-38, %v1274_v36 }
 0x573   : > { %v2022_v35 = vmul.f32 %v2789_v19, %v2021_v22 }
 0x574   : > { %v2134_v53 = vmul.f32 %v2791_v23, %v2133_v45 }
 0x575   : > { %v2023_v38 = vadd.f32 %v2789_v19, %v2022_v35  ;;  %v2793_v4 = vpop.eup %2792 }
 0x576   : > { %v2135_v61 = vadd.f32 %v2791_v23, %v2134_v53  ;;  %v1264_v9 = vmul.f32 %v2793_v4, %v1233_v16  ;;  %vm1269_vm2 = vweird.f32 %v2793_v4 }
 0x577   : > { %v2027_v44 = vsel %vm2026_vm5, %v2789_v19, %v2023_v38  ;;  %vm1270_vm4 = vmor %vm1268_vm3, %vm1269_vm2  ;;  %vm1273_vm5 = vcmp.eq.f32.partialorder %v1272_v14, 8.507059e+37  ;;  %v2750_v14 = vld [vmem:[%s3520_s8] ss:$0 sm:$0xff]  ;;  %s3525_s8 = sld [smem:[#allocation25_spill]] }
 0x578   : > { %v2032_v25 = vsel %vm2029_vm6, %v2031_v40, %v2027_v44  ;;  %v2139_v26 = vsel %vm2138_vm14, %v2791_v23, %v2135_v61  ;;  %v1265_v10 = vsub.f32 1.0, %v1264_v9  ;;  %vm1461_vm6 = vcmask 64512  }
 0x579   : > { %v2033_v47 = vmul.f32 %v2032_v25, %v2015_v24  ;;  %v2144_v3 = vsel %vm2141_vm1, %v2143_v56, %v2139_v26 }
 0x57a   : > { %v2017_v46 = vpop.f32.mrf.mxu1  ;;  %v1266_v13 = vmul.f32 %v2793_v4, %v1265_v10 }
 0x57b   : > { %2147 = vrot.lane.b32.xlu0 %v2033_v47, %s2923_s6 }
 0x57c   : > { %v1267_v49 = vadd.f32 %v2793_v4, %v1266_v13 }
 0x57e   : > { %v2071_v34 = vpop.f32.mrf.mxu2  ;;  %1761 = vadd.xlane.f32.xlu2 %v1760_v50  ;;  %v1271_v5 = vsel %vm1270_vm4, %v2793_v4, %v1267_v49 }
 0x57f   : > { %v2089_v59 = vmul.f32 %v2088_v54, %v2071_v34  ;;  %v1276_v17 = vsel %vm1273_vm5, %v1275_v32, %v1271_v5 }
 0x580   : > { %v2127_v41 = vpop.f32.mrf.mxu0  ;;  %v1277_v42 = vmul.f32 %v1276_v17, %v3234_v27 }
 0x581   : > { %1707 = vadd.xlane.f32.xlu1 %v1706_v58  ;;  %v2145_v33 = vmul.f32 %v2144_v3, %v2127_v41 }
 0x583   : > { %2151 = vrot.lane.b32.xlu0 %v2089_v59, %s3516_s5 }
 0x586   : > { %v2073_v2 = vpop.f32.mrf.mxu2  ;;  %v1455_v21 = vpop.permute.xlu1 %1454 }
 0x588   : > { %v2129_v28 = vpop.f32.mrf.mxu0 }
 0x589   : > { %1596 = vadd.xlane.f32.xlu1 %v1595_v6  ;;  %v2749_v28 = vld [vmem:[%s3519_s10] ss:$0 sm:$0xff]  ;;  %s3524_s10 = sld [smem:[#allocation24_spill]] }
 0x58b   : > { %2155 = vrot.lane.b32.xlu0 %v2145_v33, %s2924_s3 }
 0x58d   : > { %v3389_v7 = vpop.f32.mrf.mxu3 }
 0x595   : > { %v1781_v43 = vpop.f32.mrf.mxu3 }
 0x59d   : > { %v3391_v8 = vpop.f32.mrf.mxu3 }
 0x59f   : > { %v1451_v29 = vpop.permute.xlu2 %1450 }
 0x5a0   : > { %v1462_v19 = vsel %vm1461_vm6, %v1277_v42, %v1451_v29 }
 0x5a1   : > { %v1464_v22 = vsel %vm1463_vm7, %v1462_v19, %v1455_v21 }
 0x5a5   : > { %v1958_v15 = vpop.f32.mrf.mxu3 }
 0x5a7   : > { %v1459_v20 = vpop.permute.xlu2 %1458 }
 0x5a8   : > { %v1466_v24 = vsel %vm1465_vm10, %v1464_v22, %v1459_v20 }
 0x5af   : > { %v2164_v46 = vpop.permute.xlu2 %2163 }
 0x5b1   : > { %v1938_v18 = vpop.xlane.xlu1 %1937 }
 0x5b2   : > { %v1971_v50 = vand.u32 2147483648, %v1938_v18  ;;  %vm1965_vm11 = vweird.f32 %v1938_v18  ;;  %v1969_v34 = vand.u32 2147483647, %v1938_v18 }
 0x5b4   : > { %v1972_v54 = vor.u32 1.1754944e-38, %v1971_v50  ;;  %vm1970_vm13 = vcmp.eq.f32.partialorder %v1969_v34, 8.507059e+37 }
 0x5b5   : > { %1653 = vadd.xlane.f32.xlu0 %v1652_v11 }
 0x5c9   : > { %v1470_v23 = vpop.permute.xlu1 %1469 }
 0x5ca   : > { %v1472_v31 = vmul.f32 %v1470_v23, %v1466_v24 }
 0x5cc   : > { %v1477_v35 = vadd.f32 %v2747_v30, %v1472_v31 }
 0x5ce   : > { %v1479_v1 = vmin.f32 %v1477_v35, 0.0  ;;  %vm1478_vm8 = vcmp.gt.f32.partialorder %v1477_v35, 0.0 }
 0x5d0   : > { %v1480_v37 = vmul.f32 1.442695, %v1479_v1 }
 0x5d2   : > { %2794 = vpow2.f32 %v1480_v37 }
 0x5d3   : > { %2796 = vrcp.f32 %v1938_v18 }
 0x5d8   : > { %v2795_v38 = vpop.eup %2794 }
 0x5d9   : > { %v2577_v40 = vadd.f32 -1.0, %v2795_v38  ;;  %v2797_v45 = vpop.eup %2796 }
 0x5da   : > { %v1961_v47 = vmul.f32 %v2797_v45, %v1938_v18  ;;  %vm1966_vm9 = vweird.f32 %v2797_v45 }
 0x5db   : > { %v3401_v27 = vsel %vm1478_vm8, %v1477_v35, %v2577_v40  ;;  %vm1967_vm12 = vmor %vm1965_vm11, %vm1966_vm9 }
 0x5dc   : > { %v2183_v44 = vmul.f32 %v2748_v39, %v3401_v27  ;;  %v1962_v48 = vsub.f32 1.0, %v1961_v47 }
 0x5de   : > { %v2184_v25 = vsel %vm1190_vm0, %v2183_v44, 0.0  ;;  %v1963_v51 = vmul.f32 %v2797_v45, %v1962_v48 }
 0x5df   : > { %2185 = vadd.xlane.f32.xlu0 %v2184_v25 }
 0x5e0   : > { %v1964_v52 = vadd.f32 %v2797_v45, %v1963_v51 }
 0x5e2   : > { %v1968_v55 = vsel %vm1967_vm12, %v2797_v45, %v1964_v52  ;;  %v2196_v52 = vstv %s2178_s11 }
 0x5e3   : > { %v1973_v58 = vsel %vm1970_vm13, %v1972_v54, %v1968_v55 }
 0x5e4   : > { %v1974_v62 = vmul.f32 %v1973_v58, %v3391_v8 }
 0x5ed   : > { %v2148_v12 = vpop.permute.xlu0 %2147 }
 0x5ee   : > { %v2158_v26 = vsel %vm1461_vm6, %v1974_v62, %v2148_v12 }
 0x5f1   : > { %v1762_v53 = vpop.xlane.xlu2 %1761 }
 0x5f2   : > { %2798 = vrcp.f32 %v1762_v53  ;;  %v1794_v56 = vand.u32 2147483648, %v1762_v53  ;;  %v1792_v33 = vand.u32 2147483647, %v1762_v53  ;;  %vm1788_vm14 = vweird.f32 %v1762_v53 }
 0x5f4   : > { %v1795_v4 = vor.u32 1.1754944e-38, %v1794_v56  ;;  %vm1793_vm2 = vcmp.eq.f32.partialorder %v1792_v33, 8.507059e+37  ;;  %v1708_v21 = vpop.xlane.xlu1 %1707 }
 0x5f5   : > { %v2152_v41 = vpop.permute.xlu0 %2151  ;;  %v1740_v30 = vand.u32 2147483648, %v1708_v21  ;;  %vm1734_vm5 = vweird.f32 %v1708_v21  ;;  %v1738_v22 = vand.u32 2147483647, %v1708_v21 }
 0x5f6   : > { %v2159_v3 = vsel %vm1463_vm7, %v2158_v26, %v2152_v41 }
 0x5f7   : > { %v1741_v24 = vor.u32 1.1754944e-38, %v1740_v30  ;;  %vm1739_vm9 = vcmp.eq.f32.partialorder %v1738_v22, 8.507059e+37 }
 0x5f8   : > { %v2799_v59 = vpop.eup %2798 }
 0x5f9   : > { %v1784_v61 = vmul.f32 %v2799_v59, %v1762_v53  ;;  %vm1789_vm15 = vweird.f32 %v2799_v59 }
 0x5fa   : > { %vm1790_vm1 = vmor %vm1788_vm14, %vm1789_vm15 }
 0x5fb   : > { %v1785_v0 = vsub.f32 1.0, %v1784_v61 }
 0x5fc   : > { %v1597_v55 = vpop.xlane.xlu1 %1596 }
 0x5fd   : > { %v1786_v2 = vmul.f32 %v2799_v59, %v1785_v0  ;;  %v2156_v6 = vpop.permute.xlu0 %2155 }
 0x5fe   : > { %v2160_v43 = vsel %vm1465_vm10, %v2159_v3, %v2156_v6  ;;  %v1632_v6 = vand.u32 2147483648, %v1597_v55 }
 0x5ff   : > { %v2166_v16 = vmul.f32 %v2164_v46, %v2160_v43  ;;  %v1787_v15 = vadd.f32 %v2799_v59, %v1786_v2  ;;  %v1630_v43 = vand.u32 2147483647, %v1597_v55 }
 0x601   : > { %v2171_v8 = vadd.f32 %v2749_v28, %v2166_v16  ;;  %v1791_v9 = vsel %vm1790_vm1, %v2799_v59, %v1787_v15  ;;  %vm1626_vm1 = vweird.f32 %v1597_v55 }
 0x602   : > { %v1796_v10 = vsel %vm1793_vm2, %v1795_v4, %v1791_v9  ;;  %v1633_v9 = vor.u32 1.1754944e-38, %v1632_v6 }
 0x603   : > { %v2173_v11 = vmin.f32 %v2171_v8, 0.0  ;;  %v1797_v13 = vmul.f32 %v1796_v10, %v3389_v7  ;;  %vm2172_vm3 = vcmp.gt.f32.partialorder %v2171_v8, 0.0 }
 0x605   : > { %v2174_v49 = vmul.f32 1.442695, %v2173_v11  ;;  %1807 = vrot.lane.b32.xlu1 %v1797_v13, %s2924_s3  ;;  %s3521_s3 = sld [smem:[#allocation11_spill]] }
 0x607   : > { %2800 = vpow2.f32 %v2174_v49 }
 0x608   : > { %2802 = vrcp.f32 %v1708_v21 }
 0x60d   : > { %v2801_v36 = vpop.eup %2800 }
 0x60e   : > { %v2608_v29 = vadd.f32 -1.0, %v2801_v36  ;;  %v2803_v32 = vpop.eup %2802 }
 0x60f   : > { %v1730_v42 = vmul.f32 %v2803_v32, %v1708_v21  ;;  %vm1735_vm4 = vweird.f32 %v2803_v32 }
 0x610   : > { %v3413_v5 = vsel %vm2172_vm3, %v2171_v8, %v2608_v29  ;;  %vm1736_vm8 = vmor %vm1734_vm5, %vm1735_vm4 }
 0x611   : > { %v2191_v17 = vmul.f32 %v2750_v14, %v3413_v5  ;;  %v1731_v7 = vsub.f32 1.0, %v1730_v42 }
 0x613   : > { %v2192_v18 = vsel %vm1190_vm0, %v2191_v17, 0.0  ;;  %v1732_v19 = vmul.f32 %v2803_v32, %v1731_v7 }
 0x614   : > { %2193 = vadd.xlane.f32.xlu2 %v2192_v18 }
 0x615   : > { %v1733_v20 = vadd.f32 %v2803_v32, %v1732_v19 }
 0x617   : > { %v1737_v23 = vsel %vm1736_vm8, %v2803_v32, %v1733_v20  ;;  %vm1631_vm8 = vcmp.eq.f32.partialorder %v1630_v43, 8.507059e+37  ;;  %v2818_v43 = vld [vmem:[%s3155_s22] sm:$0xff]  ;;  %s1055_s22 = sand.u32 1, %s2873_s1  }
 0x618   : > { %v1742_v31 = vsel %vm1739_vm9, %v1741_v24, %v1737_v23  ;;  %s2545_s11 = sshll.u32 %s1055_s22, 3 }
 0x619   : > { %v1743_v1 = vmul.f32 %v1742_v31, %v3312_v57 }
 0x628   : > { %v1654_v35 = vpop.xlane.xlu0 %1653 }
 0x629   : > { %2804 = vrcp.f32 %v1654_v35  ;;  %v1686_v40 = vand.u32 2147483648, %v1654_v35  ;;  %v1684_v25 = vand.u32 2147483647, %v1654_v35  ;;  %vm1680_vm12 = vweird.f32 %v1654_v35 }
 0x62a   : > { %2806 = vrcp.f32 %v1597_v55 }
 0x62b   : > { %v1687_v47 = vor.u32 1.1754944e-38, %v1686_v40  ;;  %vm1685_vm15 = vcmp.eq.f32.partialorder %v1684_v25, 8.507059e+37 }
 0x62c   : > { %1803 = vrot.lane.b32.xlu2 %v1743_v1, %s3516_s5  ;;  %s1081_s5 = scalar_lea.vmem %s3521_s3, %s3150_s23  ;;  %s3522_s23 = sld [smem:[#allocation23_spill]] }
 0x62d   : > { %v1487_v51 = vld [vmem:[%s1081_s5] sm:$0xff]  ;;  %s2223_s3 = sld [smem:[#allocation3]]  ;;  %s2638_s5 = sshll.u32 %s3112_s0, 3 }
 0x62e   : > { %s2839_s0 = scalar_lea.hbm %s3089_s26, 16 }
 0x62f   : > { %v2805_v37 = vpop.eup %2804 }
 0x630   : > { %v1676_v38 = vmul.f32 %v2805_v37, %v1654_v35  ;;  %vm1681_vm11 = vweird.f32 %v2805_v37  ;;  %v2807_v59 = vpop.eup %2806 }
 0x631   : > { %vm1682_vm13 = vmor %vm1680_vm12, %vm1681_vm11  ;;  %vm1627_vm14 = vweird.f32 %v2807_v59 }
 0x632   : > { %v1677_v39 = vsub.f32 1.0, %v1676_v38  ;;  %vm1628_vm3 = vmor %vm1626_vm1, %vm1627_vm14  ;;  %v2751_v17 = vld [vmem:[%s3522_s23] ss:$0 sm:$0xff]  ;;  %s2373_s23 = scalar_lea.hbm %s3089_s26, %s2638_s5 }
 0x634   : > { %v1678_v44 = vmul.f32 %v2805_v37, %v1677_v39 }
 0x636   : > { %v1679_v45 = vadd.f32 %v2805_v37, %v1678_v44 }
 0x638   : > { %v1683_v48 = vsel %vm1682_vm13, %v2805_v37, %v1679_v45  ;;  %v2753_v37 = vld [vmem:[%s3524_s10] ss:$0 sm:$0xff]  ;;  %v2241_v45 = vstv %s2223_s3  ;;  %vm2344_vm13 = vcmask 523264   ;;  %s2377_s3 = sshll.u32 %s2373_s23, 4  ;;  %s2378_s3 = int_to_ptr.hbm [resolvable:$true] %s2377_s3 }
 0x639   : > { %v1688_v46 = vsel %vm1685_vm15, %v1687_v47, %v1683_v48 }
 0x63a   : > { %v1689_v57 = vmul.f32 %v1688_v46, %v3314_v60  ;;  %v1622_v60 = vmul.f32 %v2807_v59, %v1597_v55  ;;  %v2648_v46 = vld [vmem:[%s3525_s8 + $0x8] sm:$0xff]  ;;  %v2651_v55 = vld [vmem:[%s3079_s29 + $0x10] sm:$0xff] }
 0x63b   : > { %2299 = vmatpush.bf16.msrb.mxu3 %v2648_v46 }
 0x63c   : > { %1799 = vrot.lane.b32.xlu0 %v1689_v57, %s2923_s6  ;;  %v1623_v0 = vsub.f32 1.0, %v1622_v60  ;;  %s3523_s6 = sld [smem:[#allocation17_spill]] }
 0x63e   : > { %v1624_v26 = vmul.f32 %v2807_v59, %v1623_v0 }
 0x640   : > { %v1625_v3 = vadd.f32 %v2807_v59, %v1624_v26 }
 0x642   : > { %v1629_v4 = vsel %vm1628_vm3, %v2807_v59, %v1625_v3  ;;  %v2752_v23 = vld [vmem:[%s3523_s6] ss:$0 sm:$0xff]  ;;  %s1057_s6 = scalar_lea.vmem [#allocation4], %s2545_s11 }
 0x643   : > { %v1634_v13 = vsel %vm1631_vm8, %v1633_v9, %v1629_v4  ;;  %v2650_v4 = vld [vmem:[%s3079_s29 + $0x8] sm:$0xff]  ;;  %v2754_v9 = vld [vmem:[%s3526_s4] ss:$0 sm:$0xff]  ;;  %s2375_s10 = sshll.u32 %s1057_s6, 4  ;;  %s2363_s4 = scalar_lea.sflag [#allocation5], %s1055_s22  ;;  %s2376_s10 = int_to_ptr.vmem [resolvable:$true] %s2375_s10 }
 0x644   : > { %1815 = vperm.xlu0 %2746, %v1487_v51   ;;  %v1635_v36 = vmul.f32 %v1634_v13, %v3321_v63  ;;  %v2647_v51 = vld [vmem:[%s3525_s8] sm:$0xff]  ;;  %s2833_s8 = sshra.s32 %s2378_s3, 4  ;;  %s2834_s8 = int_to_ptr.hbm [resolvable:$true] %s2833_s8 }
 0x645   : > { %2300 = vmatpush.bf16.msrb.mxu3 %v2647_v51  ;;  %s2835_s9 = scalar_lea.hbm %s2834_s8, 8  ;;  %p2840_p0 = scmp.lt.s32.totalorder %s2834_s8, %s3089_s26 }
 0x646   : > { %p2836_p11 = scmp.ne.s32.totalorder %s2834_s8, %s2835_s9  ;;  %p2841_p1 = scmp.lt.s32.totalorder %s2839_s0, %s2835_s9 }
 0x648   : > { %p2837_p12 = pnand %p2836_p11, %p3129_p5  ;;  %p2842_p2 = por %p2841_p1, %p2840_p0 }
 0x64a   : > { %p2838_p13 = pneg %p2837_p12 }
 0x64c   : > { %p2843_p3 = pnand %p2842_p2, %p2838_p13 }
 0x652   : > { %v2186_v12 = vpop.xlane.xlu0 %2185 }
 0x677   : > { %v1808_v22 = vpop.permute.xlu1 %1807 }
 0x687   : > { %v2194_v50 = vpop.xlane.xlu2 %2193 }
 0x688   : > { %v2195_v53 = vadd.f32 %v2194_v50, %v2186_v12 }
 0x68a   : > { %v2197_v34 = vadd.f32 %v2196_v52, %v2195_v53  ;;  %v2652_v53 = vld [vmem:[%s3079_s29 + $0x18] sm:$0xff] }
 0x68b   : > { %2352 = vmatpush.bf16.msrb.mxu1 %v2652_v53 }
 0x68c   : > { %v2609_v54 = vclamps-f32 %v2197_v34, 30.0 }
 0x68e   : > { %v2200_v41 = vsub.f32 0.0, %v2609_v54 }
 0x68f   : > { %v1804_v7 = vpop.permute.xlu2 %1803  ;;  %2353 = vmatpush.bf16.msrb.mxu1 %v2651_v55 }
 0x690   : > { %v2201_v58 = vmul.f32 1.442695, %v2200_v41 }
 0x692   : > { %2808 = vpow2.f32 %v2201_v58 }
 0x693   : > { %2354 = vmatpush.bf16.msrb.mxu1 %v2650_v4 }
 0x698   : > { %v2809_v61 = vpop.eup %2808 }
 0x699   : > { %v2203_v62 = vadd.f32 1.0, %v2809_v61 }
 0x69b   : > { %2810 = vrcp.f32 %v2203_v62  ;;  %v2215_v33 = vand.u32 2147483648, %v2203_v62  ;;  %v2213_v15 = vand.u32 2147483647, %v2203_v62  ;;  %vm2209_vm4 = vweird.f32 %v2203_v62 }
 0x69d   : > { %v2216_v10 = vor.u32 1.1754944e-38, %v2215_v33  ;;  %vm2214_vm9 = vcmp.eq.f32.partialorder %v2213_v15, 8.507059e+37 }
 0x6a1   : > { %v2811_v56 = vpop.eup %2810 }
 0x6a2   : > { %v2205_v2 = vmul.f32 %v2811_v56, %v2203_v62  ;;  %vm2210_vm2 = vweird.f32 %v2811_v56 }
 0x6a3   : > { %vm2211_vm5 = vmor %vm2209_vm4, %vm2210_vm2 }
 0x6a4   : > { %v2206_v28 = vsub.f32 1.0, %v2205_v2 }
 0x6a6   : > { %v2207_v16 = vmul.f32 %v2811_v56, %v2206_v28 }
 0x6a8   : > { %v2208_v8 = vadd.f32 %v2811_v56, %v2207_v16 }
 0x6aa   : > { %v2212_v11 = vsel %vm2211_vm5, %v2811_v56, %v2208_v8  ;;  %v2649_v8 = vld [vmem:[%s3079_s29] sm:$0xff] }
 0x6ab   : > { %v2217_v49 = vsel %vm2214_vm9, %v2216_v10, %v2212_v11  ;;  %2355 = vmatpush.bf16.msrb.mxu1 %v2649_v8 }
 0x6ac   : > { %v2220_v21 = vsub.f32 1.0, %v2217_v49  ;;  %v2219_v29 = vmul.f32 %v2217_v49, %v3401_v27 }
 0x6ae   : > { %v1800_v14 = vpop.permute.xlu0 %1799  ;;  %v2221_v32 = vmul.f32 %v2220_v21, %v3413_v5 }
 0x6af   : > { %v1810_v18 = vsel %vm1461_vm6, %v1635_v36, %v1800_v14  ;;  %v2755_v36 = vld [vmem:[%s3084_s14] ss:$0 sm:$0xff] }
 0x6b0   : > { %v2222_v42 = vadd.f32 %v2221_v32, %v2219_v29  ;;  %v1811_v20 = vsel %vm1463_vm7, %v1810_v18, %v1804_v7 }
 0x6b1   : > { %v1812_v63 = vsel %vm1465_vm10, %v1811_v20, %v1808_v22 }
 0x6b2   : > { %v2228_v19 = vmul.f32 %v2751_v17, %v2222_v42 }
 0x6b4   : > { %v2229_v30 = vsel %vm1190_vm0, %v2228_v19, 0.0 }
 0x6b5   : > { %2230 = vadd.xlane.f32.xlu2 %v2229_v30 }
 0x6b6   : > { %v1816_v24 = vpop.permute.xlu0 %1815 }
 0x6b7   : > { %v1818_v27 = vmul.f32 %v1816_v24, %v1812_v63 }
 0x6b9   : > { %v1823_v31 = vadd.f32 %v2752_v23, %v1818_v27 }
 0x6bb   : > { %v1825_v5 = vmin.f32 %v1823_v31, 0.0  ;;  %vm1824_vm6 = vcmp.gt.f32.partialorder %v1823_v31, 0.0 }
 0x6bd   : > { %v1826_v35 = vmul.f32 1.442695, %v1825_v5 }
 0x6bf   : > { %2812 = vpow2.f32 %v1826_v35 }
 0x6c5   : > { %v2813_v1 = vpop.eup %2812 }
 0x6c6   : > { %v2595_v38 = vadd.f32 -1.0, %v2813_v1 }
 0x6c8   : > { %v1829_v39 = vsel %vm1824_vm6, %v1823_v31, %v2595_v38 }
 0x6c9   : > { %v2236_v40 = vmul.f32 %v2753_v37, %v1829_v39 }
 0x6cb   : > { %v2237_v44 = vsel %vm1190_vm0, %v2236_v40, 0.0 }
 0x6cc   : > { %2238 = vadd.xlane.f32.xlu1 %v2237_v44 }
 0x728   : > { %v2231_v25 = vpop.xlane.xlu2 %2230 }
 0x73f   : > { %v2239_v47 = vpop.xlane.xlu1 %2238 }
 0x740   : > { %v2240_v48 = vadd.f32 %v2239_v47, %v2231_v25 }
 0x742   : > { %v2242_v57 = vadd.f32 %v2241_v45, %v2240_v48 }
 0x744   : > { %v2610_v12 = vclamps-f32 %v2242_v57, 30.0 }
 0x746   : > { %v2245_v52 = vsub.f32 0.0, %v2610_v12 }
 0x748   : > { %v2246_v50 = vmul.f32 1.442695, %v2245_v52 }
 0x74a   : > { %2814 = vpow2.f32 %v2246_v50 }
 0x750   : > { %v2815_v34 = vpop.eup %2814 }
 0x751   : > { %v2248_v54 = vadd.f32 1.0, %v2815_v34 }
 0x753   : > { %2816 = vrcp.f32 %v2248_v54  ;;  %v2260_v61 = vand.u32 2147483648, %v2248_v54  ;;  %v2258_v62 = vand.u32 2147483647, %v2248_v54  ;;  %vm2254_vm10 = vweird.f32 %v2248_v54 }
 0x755   : > { %v2261_v26 = vor.u32 1.1754944e-38, %v2260_v61  ;;  %vm2259_vm12 = vcmp.eq.f32.partialorder %v2258_v62, 8.507059e+37 }
 0x759   : > { %v2817_v41 = vpop.eup %2816 }
 0x75a   : > { %v2250_v58 = vmul.f32 %v2817_v41, %v2248_v54  ;;  %vm2255_vm7 = vweird.f32 %v2817_v41 }
 0x75b   : > { %vm2256_vm11 = vmor %vm2254_vm10, %vm2255_vm7 }
 0x75c   : > { %v2251_v59 = vsub.f32 1.0, %v2250_v58 }
 0x75e   : > { %v2252_v60 = vmul.f32 %v2817_v41, %v2251_v59 }
 0x760   : > { %v2253_v0 = vadd.f32 %v2817_v41, %v2252_v60 }
 0x762   : > { %v2257_v56 = vsel %vm2256_vm11, %v2817_v41, %v2253_v0 }
 0x763   : > { %v2262_v2 = vsel %vm2259_vm12, %v2261_v26, %v2257_v56 }
 0x764   : > { %v2265_v3 = vsub.f32 1.0, %v2262_v2  ;;  %v2264_v28 = vmul.f32 %v2262_v2, %v2222_v42 }
 0x766   : > { %v2266_v6 = vmul.f32 %v2265_v3, %v1829_v39 }
 0x768   : > { %v2267_v33 = vadd.f32 %v2266_v6, %v2264_v28 }
 0x76a   : > { %v2268_v16 = vadd.f32 %v2818_v43, %v2267_v33 }
 0x76c   : > { %v2269_v15 = vpack.c.bf16 %v2268_v16, %v2268_v16 }
 0x76e   : > { %2619 = vmatmul.msk.bf16.vlgmr.msrb.gmra.mxu3 %vm1190_vm0, %v2269_v15 }
 0x7f1   : > { %v2302_v10 = vpop.f32.mrf.mxu3 }
 0x7f2   : > { %v2303_v11 = vadd.f32 %v2754_v9, %v2302_v10 }
 0x7f4   : > { %v2306_v13 = vmax.f32 %v2303_v11, 0.0 }
 0x7f6   : > { %v2307_v49 = vpack.c.bf16 %v2306_v13, %v2306_v13 }
 0x7f8   : > { %2636 = vmatmul.msk.bf16.vlgmr.msrb.gmra.mxu1 %vm2344_vm13, %v2307_v49 }
 0x7f9   : > { %v2304_v21 = vpop.f32.mrf.mxu3 }
 0x875   : > { %v2357_v14 = vpop.f32.mrf.mxu1 }
 0x876   : > { %v2358_v29 = vadd.f32 %v2755_v36, %v2357_v14 }
 0x878   : > { %2361 = vst.msk [vmem:[%s1057_s6] sm:$0xff] %vm1190_vm0, %v2358_v29 }
 0x879   : > { %2846 = shalt.err (!%p2843_p3)
}
 0x87a   : > { %2653 = dma.vmem_to_hbm [thread:$0]  (%p3129_p5), %s2376_s10, 128, %s2378_s3, %s2363_s4  }
 0x87d   : > { %v2359_v32 = vpop.f32.mrf.mxu1 }
 0x87e PF: > { %p2659_p4 = scmp.ge.s32.totalorder %s2881_s7, 2  ;;  %s2389_s22 = sand.u32 1, %s2869_s28  }
 0x87f   : > { %s2390_s5 = scalar_lea.sflag [#allocation5], %s2389_s22 }
 0x880   : > { %p2656_p7 = pnand %p2659_p4, %p3133_p6 }
 0x882   : > { %p2657_p8 = pneg %p2656_p7 }
 0x884   : > { %2864 = dma.done.wait (%p2657_p8), %s2390_s5, 128  }
 0x885   : > { %2866 = vsyncadd (%p2657_p8), %s2390_s5, 4294967168  ;;  %p77_p9 = scmp.ge.s32.totalorder %s3116_s25, 4   ;;  %s3527_s28 = smov %s2873_s1 }
 0x886   : > { %s3528_s1 = smov %s2877_s2  ;;  %s3529_s2 = smov %s3127_s15 }
 0x887   : > { %s3530_s7 = smov %s3116_s25  ;;  %79 = sbr.rel (!%p77_p9) target bundleno = 59 (0x3b), region = 233 }
 0x88c   :  { %2396 = vsyncpa [#allocation5], 1 }
 0x88d   :  { %2398 = vsyncpa [#allocation5 + $0x1], 1 }

</bundles_post_ra>
